<compile_context>
chip_gen: v5e
topology: v5e:2x2
jax: 0.10.0
libtpu: 0.0.40
codegen_flags: <defaults>
</compile_context>

<pallas_src>
import math
from functools import partial

import jax
import jax.numpy as jnp
from jax import lax
from jax.experimental import pallas as pl
from jax.experimental.pallas import tpu as pltpu

# ---------------- model hyper-parameters (small, consistent with the module) ----
D_MODEL = 32
H = 4
D_K = D_MODEL // H
T = 8
B = 2


# ================================ fused Pallas kernel ============================
def _tasa_fused_kernel(*refs, has_prev, dm, h, dk, seq):
    if has_prev:
        (xcat_ref, wqkv_ref, wo_ref, mask_ref, prev_ref,
         lt_ref, la_ref, rsh_ref, bt_ref, ba_ref, y_ref, a_ref) = refs
    else:
        (xcat_ref, wqkv_ref, wo_ref, mask_ref, y_ref, a_ref) = refs

    # ---- fused QKV projection: (T, 3*dm) @ block-diag(Wq^T, Wk^T, Wv^T) --------
    x = xcat_ref[0]                                                   # (T, 3*dm)
    qkv = jnp.dot(x, wqkv_ref[...], preferred_element_type=jnp.float32)

    # ---- per-head scores Q @ K^T, stacked along rows -> (h*T, T) ---------------
    dn = (((1,), (1,)), ((), ()))          # contract last dims (no explicit .T)
    tiles = []
    for hh in range(h):
        qh = qkv[:, hh * dk:(hh + 1) * dk]                            # (T, dk)
        kh = qkv[:, dm + hh * dk: dm + (hh + 1) * dk]                 # (T, dk)
        tiles.append(lax.dot_general(qh, kh, dn,
                                     preferred_element_type=jnp.float32))
    m2 = jnp.concatenate(tiles, axis=0)                               # (h*T, T)

    # ---- 3x3 convs as  sum_dx  L_dx @ X @ R_dx  + bias -------------------------
    if has_prev:
        prev2 = prev_ref[0]                                           # (h*T, T)
        acc_t = jnp.zeros((h * seq, seq), jnp.float32)
        for dx in range(3):
            shifted = jnp.dot(prev2, rsh_ref[dx],
                              preferred_element_type=jnp.float32)
            acc_t = acc_t + jnp.dot(lt_ref[dx], shifted,
                                    preferred_element_type=jnp.float32)
        mt = acc_t + bt_ref[...]                                      # (h*T, T)

        xa = jnp.concatenate([m2, mt], axis=0)                        # (2*h*T, T)
        acc_a = jnp.zeros((h * seq, seq), jnp.float32)
        for dx in range(3):
            shifted = jnp.dot(xa, rsh_ref[dx],
                              preferred_element_type=jnp.float32)
            acc_a = acc_a + jnp.dot(la_ref[dx], shifted,
                                    preferred_element_type=jnp.float32)
        ma = acc_a + ba_ref[...]                                      # (h*T, T)
    else:
        ma = m2

    # ---- softmax along key axis (scaled by 1/sqrt(d_model)) --------------------
    s = ma * (1.0 / math.sqrt(float(dm)))
    s = s - jnp.max(s, axis=-1, keepdims=True)
    e = jnp.exp(s)
    a = e * pl.reciprocal(jnp.sum(e, axis=-1, keepdims=True), approx=True)

    # PyTorch reference applies masked_fill AFTER the softmax -- reproduce exactly.
    mrow = mask_ref[0]                                                # (1, T)
    a = jnp.where(mrow == 0.0, -1.0e9, a)                             # lane bcast
    a_ref[0] = a                                                      # (h*T, T)

    # ---- A @ V per head, assembled directly in (T, d_model) layout -------------
    outs = []
    for hh in range(h):
        ah = a[hh * seq:(hh + 1) * seq, :]                            # (T, T)
        vh = qkv[:, 2 * dm + hh * dk: 2 * dm + (hh + 1) * dk]         # (T, dk)
        outs.append(jnp.dot(ah, vh, preferred_element_type=jnp.float32))
    out = jnp.concatenate(outs, axis=1)                               # (T, dm)

    # ---- output projection ------------------------------------------------------
    y_ref[0] = jnp.dot(out, wo_ref[...], preferred_element_type=jnp.float32)


# ============================ parameter preparation ==============================
def _conv_as_matmuls(w, bias, seq):
    """Exact rewrite of a 3x3 'same'-padded conv on a (Cin, seq, seq) plane held
    as a (Cin*seq, seq) slab:   Y = sum_dx  L_dx @ X @ R_dx  + bias2.
    Returns L: (3, Cout*seq, Cin*seq) and bias2: (Cout*seq, 1)."""
    cout, cin = w.shape[0], w.shape[1]
    rows = jnp.arange(cout * seq)
    cols = jnp.arange(cin * seq)
    o, y = rows // seq, rows % seq
    c, y2 = cols // seq, cols % seq
    dy = y2[None, :] - y[:, None] + 1                  # (Cout*seq, Cin*seq)
    valid = (dy >= 0) & (dy <= 2)
    dyc = jnp.clip(dy, 0, 2)
    mats = []
    for dx in range(3):
        vals = w[o[:, None], c[None, :], dyc, dx]
        mats.append(jnp.where(valid, vals, 0.0))
    left = jnp.stack(mats, axis=0).astype(jnp.float32)
    bias2 = jnp.repeat(bias, seq).reshape(cout * seq, 1).astype(jnp.float32)
    return left, bias2


def _shift_mats(seq):
    # (X @ R_dx)[r, x] = X[r, x + dx - 1]  (zero outside the plane)
    return jnp.stack([jnp.eye(seq, seq, k=1 - dx, dtype=jnp.float32)
                      for dx in range(3)], axis=0)


def prepare_tasa_params(params):
    """One-time parameter prep (outside the hot path): block-diag QKV weight,
    pre-transposed w_o, and dense conv-as-matmul operators."""
    dm = params["w_q"].shape[0]
    wqkv = jnp.zeros((3 * dm, 3 * dm), jnp.float32)
    wqkv = wqkv.at[0:dm, 0:dm].set(params["w_q"].T)
    wqkv = wqkv.at[dm:2 * dm, dm:2 * dm].set(params["w_k"].T)
    wqkv = wqkv.at[2 * dm:, 2 * dm:].set(params["w_v"].T)
    lt, bt = _conv_as_matmuls(params["tr_w"], params["tr_b"], T)
    la, ba = _conv_as_matmuls(params["ag_w"], params["ag_b"], T)
    return {
        "wqkv_bd": wqkv.astype(jnp.float32),
        "wo_t": params["w_o"].T.astype(jnp.float32),
        "lt": lt, "bt": bt, "la": la, "ba": ba,
        "rsh": _shift_mats(T),
    }


# ================================ full forward ===================================
def tasa_attention_forward(prep, q, k, v, mask=None, previous_attention_scores=None):
    Bn, Tn, dm = q.shape
    hn = H
    dk = dm // hn
    has_prev = previous_attention_scores is not None

    xcat = jnp.concatenate([q, k, v], axis=-1).astype(jnp.float32)    # (B, T, 3*dm)
    if mask is None:
        mask3 = jnp.ones((Bn, 1, Tn), jnp.float32)                    # no fill
    else:
        mask3 = mask.astype(jnp.float32).reshape(Bn, 1, Tn)

    bc2 = lambda b: (0, 0)
    bc3 = lambda b: (0, 0, 0)
    per_b3 = lambda b: (b, 0, 0)

    in_specs = [
        pl.BlockSpec((1, Tn, 3 * dm), per_b3),                        # xcat
        pl.BlockSpec((3 * dm, 3 * dm), bc2),                          # wqkv_bd
        pl.BlockSpec((dm, dm), bc2),                                  # wo_t
        pl.BlockSpec((1, 1, Tn), per_b3),                             # mask
    ]
    args = [xcat, prep["wqkv_bd"], prep["wo_t"], mask3]
    if has_prev:
        prev2 = previous_attention_scores.astype(jnp.float32).reshape(Bn, hn * Tn, Tn)
        in_specs += [
            pl.BlockSpec((1, hn * Tn, Tn), per_b3),                   # prev scores
            pl.BlockSpec((3, hn * Tn, hn * Tn), bc3),                 # transmit L
            pl.BlockSpec((3, hn * Tn, 2 * hn * Tn), bc3),             # aggregate L
            pl.BlockSpec((3, Tn, Tn), bc3),                           # x-shift mats
            pl.BlockSpec((hn * Tn, 1), bc2),                          # transmit bias
            pl.BlockSpec((hn * Tn, 1), bc2),                          # aggregate bias
        ]
        args += [prev2, prep["lt"], prep["la"], prep["rsh"], prep["bt"], prep["ba"]]

    kernel = partial(_tasa_fused_kernel, has_prev=has_prev, dm=dm, h=hn, dk=dk, seq=Tn)
    y, a2 = pl.pallas_call(
        kernel,
        grid=(Bn,),
        out_shape=(jax.ShapeDtypeStruct((Bn, Tn, dm), jnp.float32),
                   jax.ShapeDtypeStruct((Bn, hn * Tn, Tn), jnp.float32)),
        in_specs=in_specs,
        out_specs=(pl.BlockSpec((1, Tn, dm), per_b3),
                   pl.BlockSpec((1, hn * Tn, Tn), per_b3)),
        compiler_params=pltpu.CompilerParams(dimension_semantics=("parallel",)),
    )(*args)
    return y, a2.reshape(Bn, hn, Tn, Tn)


# ================================ pure-JAX reference =============================
def _conv_ref(x, w, b):
    y = lax.conv_general_dilated(x, w, (1, 1), "SAME",
                                 dimension_numbers=("NCHW", "OIHW", "NCHW"))
    return y + b[None, :, None, None]


def reference_forward(params, q, k, v, mask=None, previous_attention_scores=None):
    Bn, Tn, dm = q.shape
    hn, dk = H, dm // H

    def project(x, w):
        return (x @ w.T).reshape(Bn, Tn, hn, dk).transpose(0, 2, 1, 3)

    query = project(q, params["w_q"])
    key = project(k, params["w_k"])
    value = project(v, params["w_v"])
    M = jnp.einsum("bhtd,bhsd->bhts", query, key)
    if previous_attention_scores is not None:
        Mt = _conv_ref(previous_attention_scores, params["tr_w"], params["tr_b"])
        Ma = _conv_ref(jnp.concatenate((M, Mt), axis=1), params["ag_w"], params["ag_b"])
    else:
        Ma = M
    A = jax.nn.softmax(Ma / jnp.sqrt(jnp.float32(dm)), axis=-1)
    if mask is not None:
        m = mask[:, None, None, :]
        A = jnp.where(m == 0, -1.0e9, A)
    out = jnp.einsum("bhts,bhsd->bhtd", A, value).transpose(0, 2, 1, 3).reshape(Bn, Tn, dm)
    return out @ params["w_o"].T, A


# ================================ main ===========================================
if __name__ == "__main__":
    key = jax.random.PRNGKey(0)
    keys = jax.random.split(key, 12)

    # Deterministic synthetic parameters (shapes per the module's __init__).
    params = {
        "w_q": 0.1 * jax.random.normal(keys[0], (D_MODEL, D_MODEL), jnp.float32),
        "w_k": 0.1 * jax.random.normal(keys[1], (D_MODEL, D_MODEL), jnp.float32),
        "w_v": 0.1 * jax.random.normal(keys[2], (D_MODEL, D_MODEL), jnp.float32),
        "w_o": 0.1 * jax.random.normal(keys[3], (D_MODEL, D_MODEL), jnp.float32),
        "tr_w": 0.1 * jax.random.normal(keys[4], (H, H, 3, 3), jnp.float32),
        "tr_b": 0.1 * jax.random.normal(keys[5], (H,), jnp.float32),
        "ag_w": 0.1 * jax.random.normal(keys[6], (H, 2 * H, 3, 3), jnp.float32),
        "ag_b": 0.1 * jax.random.normal(keys[7], (H,), jnp.float32),
    }

    q = jax.random.normal(keys[8], (B, T, D_MODEL), jnp.float32)
    k = jax.random.normal(keys[9], (B, T, D_MODEL), jnp.float32)
    v = jax.random.normal(keys[10], (B, T, D_MODEL), jnp.float32)
    prev = jax.random.normal(keys[11], (B, H, T, T), jnp.float32)
    # mask: (B, T); second example masks out the last 3 key positions
    mask = (jnp.arange(T)[None, :] < jnp.array([[T], [T - 3]])).astype(jnp.float32)

    prep = prepare_tasa_params(params)

    # --- full path: previous scores + mask ---------------------------------------
    y, A = tasa_attention_forward(prep, q, k, v, mask=mask,
                                  previous_attention_scores=prev)
    jax.block_until_ready((y, A))
    y_ref, A_ref = reference_forward(params, q, k, v, mask=mask,
                                     previous_attention_scores=prev)
    assert y.shape == (B, T, D_MODEL) and A.shape == (B, H, T, T)
    # approx=True reciprocal on the EUP -> allow a slightly larger tolerance.
    assert jnp.allclose(y, y_ref, atol=2e-3, rtol=2e-3), "output mismatch vs reference"
    assert jnp.allclose(A, A_ref, atol=2e-3, rtol=2e-3), "attention mismatch vs reference"

    # --- simple path: no previous scores, no mask --------------------------------
    y2, A2 = tasa_attention_forward(prep, q, k, v)
    jax.block_until_ready((y2, A2))
    y2_ref, A2_ref = reference_forward(params, q, k, v)
    assert jnp.allclose(y2, y2_ref, atol=2e-3, rtol=2e-3), "output mismatch (no prev)"
    assert jnp.allclose(A2, A2_ref, atol=2e-3, rtol=2e-3), "attention mismatch (no prev)"

    print("KERNEL_OK")
</pallas_src>

<mosaic_0001>
module attributes {stable_mosaic.version = 11 : i64} {
  func.func @_tasa_fused_kernel(%arg0: i32, %arg1: memref<1x8x96xf32, #tpu.memory_space<vmem>>, %arg2: memref<96x96xf32, #tpu.memory_space<vmem>>, %arg3: memref<32x32xf32, #tpu.memory_space<vmem>>, %arg4: memref<1x1x8xf32, #tpu.memory_space<vmem>>, %arg5: memref<1x32x8xf32, #tpu.memory_space<vmem>>, %arg6: memref<3x32x32xf32, #tpu.memory_space<vmem>>, %arg7: memref<3x32x64xf32, #tpu.memory_space<vmem>>, %arg8: memref<3x8x8xf32, #tpu.memory_space<vmem>>, %arg9: memref<32x1xf32, #tpu.memory_space<vmem>>, %arg10: memref<32x1xf32, #tpu.memory_space<vmem>>, %arg11: memref<1x8x32xf32, #tpu.memory_space<vmem>>, %arg12: memref<1x32x8xf32, #tpu.memory_space<vmem>>) attributes {dimension_semantics = [#tpu.dimension_semantics<parallel>], iteration_bounds = array<i64: 2>, scalar_prefetch = 0 : i64, scratch_operands = 0 : i64, tpu.core_type = #tpu.core_type<tc>, window_params = [{transform_indices = @transform_0, window_bounds = array<i64: 1, 8, 96>}, {pipeline_mode = #tpu.pipeline_mode<synchronous>, transform_indices = @transform_1, window_bounds = array<i64: 96, 96>}, {pipeline_mode = #tpu.pipeline_mode<synchronous>, transform_indices = @transform_2, window_bounds = array<i64: 32, 32>}, {transform_indices = @transform_3, window_bounds = array<i64: 1, 1, 8>}, {transform_indices = @transform_4, window_bounds = array<i64: 1, 32, 8>}, {pipeline_mode = #tpu.pipeline_mode<synchronous>, transform_indices = @transform_5, window_bounds = array<i64: 3, 32, 32>}, {pipeline_mode = #tpu.pipeline_mode<synchronous>, transform_indices = @transform_6, window_bounds = array<i64: 3, 32, 64>}, {pipeline_mode = #tpu.pipeline_mode<synchronous>, transform_indices = @transform_7, window_bounds = array<i64: 3, 8, 8>}, {pipeline_mode = #tpu.pipeline_mode<synchronous>, transform_indices = @transform_8, window_bounds = array<i64: 32, 1>}, {pipeline_mode = #tpu.pipeline_mode<synchronous>, transform_indices = @transform_9, window_bounds = array<i64: 32, 1>}, {transform_indices = @transform_10, window_bounds = array<i64: 1, 8, 32>}, {transform_indices = @transform_11, window_bounds = array<i64: 1, 32, 8>}]} {
    %c0 = arith.constant 0 : index
    %c0_0 = arith.constant 0 : index
    %c0_1 = arith.constant 0 : index
    %0 = vector.load %arg1[%c0, %c0_0, %c0_1] : memref<1x8x96xf32, #tpu.memory_space<vmem>>, vector<1x8x96xf32>
    %1 = vector.shape_cast %0 : vector<1x8x96xf32> to vector<8x96xf32>
    %c0_2 = arith.constant 0 : index
    %c0_3 = arith.constant 0 : index
    %2 = vector.load %arg2[%c0_2, %c0_3] : memref<96x96xf32, #tpu.memory_space<vmem>>, vector<96x96xf32>
    %cst = arith.constant dense<0.000000e+00> : vector<8x96xf32>
    %3 = tpu.matmul %1, %2, %cst {dimension_numbers = #tpu.dot_dimension_numbers<[1], [0], [0], [1], [0, 0, 1, 1], [], []>} : vector<8x96xf32>, vector<96x96xf32>, vector<8x96xf32> -> vector<8x96xf32>
    %4 = vector.extract_strided_slice %3 {offsets = [0, 0], sizes = [8, 8], strides = [1, 1]} : vector<8x96xf32> to vector<8x8xf32>
    %5 = vector.extract_strided_slice %3 {offsets = [0, 32], sizes = [8, 8], strides = [1, 1]} : vector<8x96xf32> to vector<8x8xf32>
    %cst_4 = arith.constant dense<0.000000e+00> : vector<8x8xf32>
    %6 = tpu.matmul %4, %5, %cst_4 {dimension_numbers = #tpu.dot_dimension_numbers<[1], [1], [0], [0], [0, 0, 1, 0], [], []>} : vector<8x8xf32>, vector<8x8xf32>, vector<8x8xf32> -> vector<8x8xf32>
    %7 = vector.extract_strided_slice %3 {offsets = [0, 8], sizes = [8, 8], strides = [1, 1]} : vector<8x96xf32> to vector<8x8xf32>
    %8 = vector.extract_strided_slice %3 {offsets = [0, 40], sizes = [8, 8], strides = [1, 1]} : vector<8x96xf32> to vector<8x8xf32>
    %cst_5 = arith.constant dense<0.000000e+00> : vector<8x8xf32>
    %9 = tpu.matmul %7, %8, %cst_5 {dimension_numbers = #tpu.dot_dimension_numbers<[1], [1], [0], [0], [0, 0, 1, 0], [], []>} : vector<8x8xf32>, vector<8x8xf32>, vector<8x8xf32> -> vector<8x8xf32>
    %10 = vector.extract_strided_slice %3 {offsets = [0, 16], sizes = [8, 8], strides = [1, 1]} : vector<8x96xf32> to vector<8x8xf32>
    %11 = vector.extract_strided_slice %3 {offsets = [0, 48], sizes = [8, 8], strides = [1, 1]} : vector<8x96xf32> to vector<8x8xf32>
    %cst_6 = arith.constant dense<0.000000e+00> : vector<8x8xf32>
    %12 = tpu.matmul %10, %11, %cst_6 {dimension_numbers = #tpu.dot_dimension_numbers<[1], [1], [0], [0], [0, 0, 1, 0], [], []>} : vector<8x8xf32>, vector<8x8xf32>, vector<8x8xf32> -> vector<8x8xf32>
    %13 = vector.extract_strided_slice %3 {offsets = [0, 24], sizes = [8, 8], strides = [1, 1]} : vector<8x96xf32> to vector<8x8xf32>
    %14 = vector.extract_strided_slice %3 {offsets = [0, 56], sizes = [8, 8], strides = [1, 1]} : vector<8x96xf32> to vector<8x8xf32>
    %cst_7 = arith.constant dense<0.000000e+00> : vector<8x8xf32>
    %15 = tpu.matmul %13, %14, %cst_7 {dimension_numbers = #tpu.dot_dimension_numbers<[1], [1], [0], [0], [0, 0, 1, 0], [], []>} : vector<8x8xf32>, vector<8x8xf32>, vector<8x8xf32> -> vector<8x8xf32>
    %16 = tpu.concatenate %6, %9, %12, %15 in 0 : vector<8x8xf32>, vector<8x8xf32>, vector<8x8xf32>, vector<8x8xf32> -> vector<32x8xf32>
    %c0_8 = arith.constant 0 : index
    %c0_9 = arith.constant 0 : index
    %c0_10 = arith.constant 0 : index
    %17 = vector.load %arg5[%c0_8, %c0_9, %c0_10] : memref<1x32x8xf32, #tpu.memory_space<vmem>>, vector<1x32x8xf32>
    %18 = vector.shape_cast %17 : vector<1x32x8xf32> to vector<32x8xf32>
    %cst_11 = arith.constant 0.000000e+00 : f32
    %19 = vector.broadcast %cst_11 : f32 to vector<32x8xf32>
    %c0_12 = arith.constant 0 : index
    %c0_13 = arith.constant 0 : index
    %c0_14 = arith.constant 0 : index
    %20 = vector.load %arg8[%c0_12, %c0_13, %c0_14] : memref<3x8x8xf32, #tpu.memory_space<vmem>>, vector<1x8x8xf32>
    %21 = vector.shape_cast %20 : vector<1x8x8xf32> to vector<8x8xf32>
    %cst_15 = arith.constant dense<0.000000e+00> : vector<32x8xf32>
    %22 = tpu.matmul %18, %21, %cst_15 {dimension_numbers = #tpu.dot_dimension_numbers<[1], [0], [0], [1], [0, 0, 1, 1], [], []>} : vector<32x8xf32>, vector<8x8xf32>, vector<32x8xf32> -> vector<32x8xf32>
    %c0_16 = arith.constant 0 : index
    %c0_17 = arith.constant 0 : index
    %c0_18 = arith.constant 0 : index
    %23 = vector.load %arg6[%c0_16, %c0_17, %c0_18] : memref<3x32x32xf32, #tpu.memory_space<vmem>>, vector<1x32x32xf32>
    %24 = vector.shape_cast %23 : vector<1x32x32xf32> to vector<32x32xf32>
    %cst_19 = arith.constant dense<0.000000e+00> : vector<32x8xf32>
    %25 = tpu.matmul %24, %22, %cst_19 {dimension_numbers = #tpu.dot_dimension_numbers<[1], [0], [0], [1], [0, 0, 1, 1], [], []>} : vector<32x32xf32>, vector<32x8xf32>, vector<32x8xf32> -> vector<32x8xf32>
    %26 = arith.addf %19, %25 : vector<32x8xf32>
    %c1 = arith.constant 1 : index
    %c0_20 = arith.constant 0 : index
    %c0_21 = arith.constant 0 : index
    %27 = vector.load %arg8[%c1, %c0_20, %c0_21] : memref<3x8x8xf32, #tpu.memory_space<vmem>>, vector<1x8x8xf32>
    %28 = vector.shape_cast %27 : vector<1x8x8xf32> to vector<8x8xf32>
    %cst_22 = arith.constant dense<0.000000e+00> : vector<32x8xf32>
    %29 = tpu.matmul %18, %28, %cst_22 {dimension_numbers = #tpu.dot_dimension_numbers<[1], [0], [0], [1], [0, 0, 1, 1], [], []>} : vector<32x8xf32>, vector<8x8xf32>, vector<32x8xf32> -> vector<32x8xf32>
    %c1_23 = arith.constant 1 : index
    %c0_24 = arith.constant 0 : index
    %c0_25 = arith.constant 0 : index
    %30 = vector.load %arg6[%c1_23, %c0_24, %c0_25] : memref<3x32x32xf32, #tpu.memory_space<vmem>>, vector<1x32x32xf32>
    %31 = vector.shape_cast %30 : vector<1x32x32xf32> to vector<32x32xf32>
    %cst_26 = arith.constant dense<0.000000e+00> : vector<32x8xf32>
    %32 = tpu.matmul %31, %29, %cst_26 {dimension_numbers = #tpu.dot_dimension_numbers<[1], [0], [0], [1], [0, 0, 1, 1], [], []>} : vector<32x32xf32>, vector<32x8xf32>, vector<32x8xf32> -> vector<32x8xf32>
    %33 = arith.addf %26, %32 : vector<32x8xf32>
    %c2 = arith.constant 2 : index
    %c0_27 = arith.constant 0 : index
    %c0_28 = arith.constant 0 : index
    %34 = vector.load %arg8[%c2, %c0_27, %c0_28] : memref<3x8x8xf32, #tpu.memory_space<vmem>>, vector<1x8x8xf32>
    %35 = vector.shape_cast %34 : vector<1x8x8xf32> to vector<8x8xf32>
    %cst_29 = arith.constant dense<0.000000e+00> : vector<32x8xf32>
    %36 = tpu.matmul %18, %35, %cst_29 {dimension_numbers = #tpu.dot_dimension_numbers<[1], [0], [0], [1], [0, 0, 1, 1], [], []>} : vector<32x8xf32>, vector<8x8xf32>, vector<32x8xf32> -> vector<32x8xf32>
    %c2_30 = arith.constant 2 : index
    %c0_31 = arith.constant 0 : index
    %c0_32 = arith.constant 0 : index
    %37 = vector.load %arg6[%c2_30, %c0_31, %c0_32] : memref<3x32x32xf32, #tpu.memory_space<vmem>>, vector<1x32x32xf32>
    %38 = vector.shape_cast %37 : vector<1x32x32xf32> to vector<32x32xf32>
    %cst_33 = arith.constant dense<0.000000e+00> : vector<32x8xf32>
    %39 = tpu.matmul %38, %36, %cst_33 {dimension_numbers = #tpu.dot_dimension_numbers<[1], [0], [0], [1], [0, 0, 1, 1], [], []>} : vector<32x32xf32>, vector<32x8xf32>, vector<32x8xf32> -> vector<32x8xf32>
    %40 = arith.addf %33, %39 : vector<32x8xf32>
    %c0_34 = arith.constant 0 : index
    %c0_35 = arith.constant 0 : index
    %41 = vector.load %arg9[%c0_34, %c0_35] : memref<32x1xf32, #tpu.memory_space<vmem>>, vector<32x1xf32>
    %42 = vector.broadcast %41 : vector<32x1xf32> to vector<32x8xf32>
    %43 = arith.addf %40, %42 : vector<32x8xf32>
    %44 = tpu.concatenate %16, %43 in 0 : vector<32x8xf32>, vector<32x8xf32> -> vector<64x8xf32>
    %cst_36 = arith.constant 0.000000e+00 : f32
    %45 = vector.broadcast %cst_36 : f32 to vector<32x8xf32>
    %c0_37 = arith.constant 0 : index
    %c0_38 = arith.constant 0 : index
    %c0_39 = arith.constant 0 : index
    %46 = vector.load %arg8[%c0_37, %c0_38, %c0_39] : memref<3x8x8xf32, #tpu.memory_space<vmem>>, vector<1x8x8xf32>
    %47 = vector.shape_cast %46 : vector<1x8x8xf32> to vector<8x8xf32>
    %cst_40 = arith.constant dense<0.000000e+00> : vector<64x8xf32>
    %48 = tpu.matmul %44, %47, %cst_40 {dimension_numbers = #tpu.dot_dimension_numbers<[1], [0], [0], [1], [0, 0, 1, 1], [], []>} : vector<64x8xf32>, vector<8x8xf32>, vector<64x8xf32> -> vector<64x8xf32>
    %c0_41 = arith.constant 0 : index
    %c0_42 = arith.constant 0 : index
    %c0_43 = arith.constant 0 : index
    %49 = vector.load %arg7[%c0_41, %c0_42, %c0_43] : memref<3x32x64xf32, #tpu.memory_space<vmem>>, vector<1x32x64xf32>
    %50 = vector.shape_cast %49 : vector<1x32x64xf32> to vector<32x64xf32>
    %cst_44 = arith.constant dense<0.000000e+00> : vector<32x8xf32>
    %51 = tpu.matmul %50, %48, %cst_44 {dimension_numbers = #tpu.dot_dimension_numbers<[1], [0], [0], [1], [0, 0, 1, 1], [], []>} : vector<32x64xf32>, vector<64x8xf32>, vector<32x8xf32> -> vector<32x8xf32>
    %52 = arith.addf %45, %51 : vector<32x8xf32>
    %c1_45 = arith.constant 1 : index
    %c0_46 = arith.constant 0 : index
    %c0_47 = arith.constant 0 : index
    %53 = vector.load %arg8[%c1_45, %c0_46, %c0_47] : memref<3x8x8xf32, #tpu.memory_space<vmem>>, vector<1x8x8xf32>
    %54 = vector.shape_cast %53 : vector<1x8x8xf32> to vector<8x8xf32>
    %cst_48 = arith.constant dense<0.000000e+00> : vector<64x8xf32>
    %55 = tpu.matmul %44, %54, %cst_48 {dimension_numbers = #tpu.dot_dimension_numbers<[1], [0], [0], [1], [0, 0, 1, 1], [], []>} : vector<64x8xf32>, vector<8x8xf32>, vector<64x8xf32> -> vector<64x8xf32>
    %c1_49 = arith.constant 1 : index
    %c0_50 = arith.constant 0 : index
    %c0_51 = arith.constant 0 : index
    %56 = vector.load %arg7[%c1_49, %c0_50, %c0_51] : memref<3x32x64xf32, #tpu.memory_space<vmem>>, vector<1x32x64xf32>
    %57 = vector.shape_cast %56 : vector<1x32x64xf32> to vector<32x64xf32>
    %cst_52 = arith.constant dense<0.000000e+00> : vector<32x8xf32>
    %58 = tpu.matmul %57, %55, %cst_52 {dimension_numbers = #tpu.dot_dimension_numbers<[1], [0], [0], [1], [0, 0, 1, 1], [], []>} : vector<32x64xf32>, vector<64x8xf32>, vector<32x8xf32> -> vector<32x8xf32>
    %59 = arith.addf %52, %58 : vector<32x8xf32>
    %c2_53 = arith.constant 2 : index
    %c0_54 = arith.constant 0 : index
    %c0_55 = arith.constant 0 : index
    %60 = vector.load %arg8[%c2_53, %c0_54, %c0_55] : memref<3x8x8xf32, #tpu.memory_space<vmem>>, vector<1x8x8xf32>
    %61 = vector.shape_cast %60 : vector<1x8x8xf32> to vector<8x8xf32>
    %cst_56 = arith.constant dense<0.000000e+00> : vector<64x8xf32>
    %62 = tpu.matmul %44, %61, %cst_56 {dimension_numbers = #tpu.dot_dimension_numbers<[1], [0], [0], [1], [0, 0, 1, 1], [], []>} : vector<64x8xf32>, vector<8x8xf32>, vector<64x8xf32> -> vector<64x8xf32>
    %c2_57 = arith.constant 2 : index
    %c0_58 = arith.constant 0 : index
    %c0_59 = arith.constant 0 : index
    %63 = vector.load %arg7[%c2_57, %c0_58, %c0_59] : memref<3x32x64xf32, #tpu.memory_space<vmem>>, vector<1x32x64xf32>
    %64 = vector.shape_cast %63 : vector<1x32x64xf32> to vector<32x64xf32>
    %cst_60 = arith.constant dense<0.000000e+00> : vector<32x8xf32>
    %65 = tpu.matmul %64, %62, %cst_60 {dimension_numbers = #tpu.dot_dimension_numbers<[1], [0], [0], [1], [0, 0, 1, 1], [], []>} : vector<32x64xf32>, vector<64x8xf32>, vector<32x8xf32> -> vector<32x8xf32>
    %66 = arith.addf %59, %65 : vector<32x8xf32>
    %c0_61 = arith.constant 0 : index
    %c0_62 = arith.constant 0 : index
    %67 = vector.load %arg10[%c0_61, %c0_62] : memref<32x1xf32, #tpu.memory_space<vmem>>, vector<32x1xf32>
    %68 = vector.broadcast %67 : vector<32x1xf32> to vector<32x8xf32>
    %69 = arith.addf %66, %68 : vector<32x8xf32>
    %cst_63 = arith.constant 0.176776692 : f32
    %70 = vector.broadcast %cst_63 : f32 to vector<32x8xf32>
    %71 = arith.mulf %69, %70 : vector<32x8xf32>
    %cst_64 = arith.constant dense<0xFF800000> : vector<32xf32>
    %72 = vector.multi_reduction <maximumf>, %71, %cst_64 [1] : vector<32x8xf32> to vector<32xf32>
    %73 = vector.shape_cast %72 : vector<32xf32> to vector<32x1xf32>
    %74 = vector.broadcast %73 : vector<32x1xf32> to vector<32x8xf32>
    %75 = arith.subf %71, %74 : vector<32x8xf32>
    %76 = math.exp %75 : vector<32x8xf32>
    %cst_65 = arith.constant dense<0.000000e+00> : vector<32xf32>
    %77 = vector.multi_reduction <add>, %76, %cst_65 [1] : vector<32x8xf32> to vector<32xf32>
    %78 = vector.shape_cast %77 : vector<32xf32> to vector<32x1xf32>
    %79 = tpu.reciprocal %78 {approx = true} : vector<32x1xf32> -> vector<32x1xf32>
    %80 = vector.broadcast %79 : vector<32x1xf32> to vector<32x8xf32>
    %81 = arith.mulf %76, %80 : vector<32x8xf32>
    %c0_66 = arith.constant 0 : index
    %c0_67 = arith.constant 0 : index
    %c0_68 = arith.constant 0 : index
    %82 = vector.load %arg4[%c0_66, %c0_67, %c0_68] : memref<1x1x8xf32, #tpu.memory_space<vmem>>, vector<1x1x8xf32>
    %83 = vector.shape_cast %82 : vector<1x1x8xf32> to vector<1x8xf32>
    %cst_69 = arith.constant 0.000000e+00 : f32
    %84 = vector.broadcast %cst_69 : f32 to vector<1x8xf32>
    %85 = arith.cmpf oeq, %83, %84 : vector<1x8xf32>
    %cst_70 = arith.constant -1.000000e+09 : f32
    %86 = vector.shape_cast %85 : vector<1x8xi1> to vector<1x8xi1>
    %87 = vector.broadcast %86 : vector<1x8xi1> to vector<32x8xi1>
    %88 = vector.broadcast %cst_70 : f32 to vector<32x8xf32>
    %89 = arith.select %87, %88, %81 : vector<32x8xi1>, vector<32x8xf32>
    %c0_71 = arith.constant 0 : index
    %c0_72 = arith.constant 0 : index
    %c0_73 = arith.constant 0 : index
    %90 = vector.load %arg12[%c0_71, %c0_72, %c0_73] : memref<1x32x8xf32, #tpu.memory_space<vmem>>, vector<1x32x8xf32>
    %91 = vector.shape_cast %90 : vector<1x32x8xf32> to vector<32x8xf32>
    %92 = vector.shape_cast %89 : vector<32x8xf32> to vector<1x32x8xf32>
    tpu.vector_store %arg12[%c0_71, %c0_72, %c0_73], %92 {strides = array<i32>} : memref<1x32x8xf32, #tpu.memory_space<vmem>>, vector<1x32x8xf32>,
    %93 = vector.extract_strided_slice %89 {offsets = [0, 0], sizes = [8, 8], strides = [1, 1]} : vector<32x8xf32> to vector<8x8xf32>
    %94 = vector.extract_strided_slice %3 {offsets = [0, 64], sizes = [8, 8], strides = [1, 1]} : vector<8x96xf32> to vector<8x8xf32>
    %cst_74 = arith.constant dense<0.000000e+00> : vector<8x8xf32>
    %95 = tpu.matmul %93, %94, %cst_74 {dimension_numbers = #tpu.dot_dimension_numbers<[1], [0], [0], [1], [0, 0, 1, 1], [], []>} : vector<8x8xf32>, vector<8x8xf32>, vector<8x8xf32> -> vector<8x8xf32>
    %96 = vector.extract_strided_slice %89 {offsets = [8, 0], sizes = [8, 8], strides = [1, 1]} : vector<32x8xf32> to vector<8x8xf32>
    %97 = vector.extract_strided_slice %3 {offsets = [0, 72], sizes = [8, 8], strides = [1, 1]} : vector<8x96xf32> to vector<8x8xf32>
    %cst_75 = arith.constant dense<0.000000e+00> : vector<8x8xf32>
    %98 = tpu.matmul %96, %97, %cst_75 {dimension_numbers = #tpu.dot_dimension_numbers<[1], [0], [0], [1], [0, 0, 1, 1], [], []>} : vector<8x8xf32>, vector<8x8xf32>, vector<8x8xf32> -> vector<8x8xf32>
    %99 = vector.extract_strided_slice %89 {offsets = [16, 0], sizes = [8, 8], strides = [1, 1]} : vector<32x8xf32> to vector<8x8xf32>
    %100 = vector.extract_strided_slice %3 {offsets = [0, 80], sizes = [8, 8], strides = [1, 1]} : vector<8x96xf32> to vector<8x8xf32>
    %cst_76 = arith.constant dense<0.000000e+00> : vector<8x8xf32>
    %101 = tpu.matmul %99, %100, %cst_76 {dimension_numbers = #tpu.dot_dimension_numbers<[1], [0], [0], [1], [0, 0, 1, 1], [], []>} : vector<8x8xf32>, vector<8x8xf32>, vector<8x8xf32> -> vector<8x8xf32>
    %102 = vector.extract_strided_slice %89 {offsets = [24, 0], sizes = [8, 8], strides = [1, 1]} : vector<32x8xf32> to vector<8x8xf32>
    %103 = vector.extract_strided_slice %3 {offsets = [0, 88], sizes = [8, 8], strides = [1, 1]} : vector<8x96xf32> to vector<8x8xf32>
    %cst_77 = arith.constant dense<0.000000e+00> : vector<8x8xf32>
    %104 = tpu.matmul %102, %103, %cst_77 {dimension_numbers = #tpu.dot_dimension_numbers<[1], [0], [0], [1], [0, 0, 1, 1], [], []>} : vector<8x8xf32>, vector<8x8xf32>, vector<8x8xf32> -> vector<8x8xf32>
    %105 = tpu.concatenate %95, %98, %101, %104 in 1 : vector<8x8xf32>, vector<8x8xf32>, vector<8x8xf32>, vector<8x8xf32> -> vector<8x32xf32>
    %c0_78 = arith.constant 0 : index
    %c0_79 = arith.constant 0 : index
    %106 = vector.load %arg3[%c0_78, %c0_79] : memref<32x32xf32, #tpu.memory_space<vmem>>, vector<32x32xf32>
    %cst_80 = arith.constant dense<0.000000e+00> : vector<8x32xf32>
    %107 = tpu.matmul %105, %106, %cst_80 {dimension_numbers = #tpu.dot_dimension_numbers<[1], [0], [0], [1], [0, 0, 1, 1], [], []>} : vector<8x32xf32>, vector<32x32xf32>, vector<8x32xf32> -> vector<8x32xf32>
    %c0_81 = arith.constant 0 : index
    %c0_82 = arith.constant 0 : index
    %c0_83 = arith.constant 0 : index
    %108 = vector.load %arg11[%c0_81, %c0_82, %c0_83] : memref<1x8x32xf32, #tpu.memory_space<vmem>>, vector<1x8x32xf32>
    %109 = vector.shape_cast %108 : vector<1x8x32xf32> to vector<8x32xf32>
    %110 = vector.shape_cast %107 : vector<8x32xf32> to vector<1x8x32xf32>
    tpu.vector_store %arg11[%c0_81, %c0_82, %c0_83], %110 {strides = array<i32>} : memref<1x8x32xf32, #tpu.memory_space<vmem>>, vector<1x8x32xf32>,
    return
  }
  func.func @transform_0(%arg0: i32) -> (i32, i32, i32) {
    %c0_i32 = arith.constant 0 : i32
    %c0_i32_0 = arith.constant 0 : i32
    %c0_i32_1 = arith.constant 0 : i32
    return %arg0, %c0_i32, %c0_i32_0 : i32, i32, i32
  }
  func.func @transform_1(%arg0: i32) -> (i32, i32) {
    %c0_i32 = arith.constant 0 : i32
    %c0_i32_0 = arith.constant 0 : i32
    %c0_i32_1 = arith.constant 0 : i32
    return %c0_i32, %c0_i32_0 : i32, i32
  }
  func.func @transform_2(%arg0: i32) -> (i32, i32) {
    %c0_i32 = arith.constant 0 : i32
    %c0_i32_0 = arith.constant 0 : i32
    %c0_i32_1 = arith.constant 0 : i32
    return %c0_i32, %c0_i32_0 : i32, i32
  }
  func.func @transform_3(%arg0: i32) -> (i32, i32, i32) {
    %c0_i32 = arith.constant 0 : i32
    %c0_i32_0 = arith.constant 0 : i32
    %c0_i32_1 = arith.constant 0 : i32
    return %arg0, %c0_i32, %c0_i32_0 : i32, i32, i32
  }
  func.func @transform_4(%arg0: i32) -> (i32, i32, i32) {
    %c0_i32 = arith.constant 0 : i32
    %c0_i32_0 = arith.constant 0 : i32
    %c0_i32_1 = arith.constant 0 : i32
    return %arg0, %c0_i32, %c0_i32_0 : i32, i32, i32
  }
  func.func @transform_5(%arg0: i32) -> (i32, i32, i32) {
    %c0_i32 = arith.constant 0 : i32
    %c0_i32_0 = arith.constant 0 : i32
    %c0_i32_1 = arith.constant 0 : i32
    %c0_i32_2 = arith.constant 0 : i32
    return %c0_i32, %c0_i32_0, %c0_i32_1 : i32, i32, i32
  }
  func.func @transform_6(%arg0: i32) -> (i32, i32, i32) {
    %c0_i32 = arith.constant 0 : i32
    %c0_i32_0 = arith.constant 0 : i32
    %c0_i32_1 = arith.constant 0 : i32
    %c0_i32_2 = arith.constant 0 : i32
    return %c0_i32, %c0_i32_0, %c0_i32_1 : i32, i32, i32
  }
  func.func @transform_7(%arg0: i32) -> (i32, i32, i32) {
    %c0_i32 = arith.constant 0 : i32
    %c0_i32_0 = arith.constant 0 : i32
    %c0_i32_1 = arith.constant 0 : i32
    %c0_i32_2 = arith.constant 0 : i32
    return %c0_i32, %c0_i32_0, %c0_i32_1 : i32, i32, i32
  }
  func.func @transform_8(%arg0: i32) -> (i32, i32) {
    %c0_i32 = arith.constant 0 : i32
    %c0_i32_0 = arith.constant 0 : i32
    %c0_i32_1 = arith.constant 0 : i32
    return %c0_i32, %c0_i32_0 : i32, i32
  }
  func.func @transform_9(%arg0: i32) -> (i32, i32) {
    %c0_i32 = arith.constant 0 : i32
    %c0_i32_0 = arith.constant 0 : i32
    %c0_i32_1 = arith.constant 0 : i32
    return %c0_i32, %c0_i32_0 : i32, i32
  }
  func.func @transform_10(%arg0: i32) -> (i32, i32, i32) {
    %c0_i32 = arith.constant 0 : i32
    %c0_i32_0 = arith.constant 0 : i32
    %c0_i32_1 = arith.constant 0 : i32
    return %arg0, %c0_i32, %c0_i32_0 : i32, i32, i32
  }
  func.func @transform_11(%arg0: i32) -> (i32, i32, i32) {
    %c0_i32 = arith.constant 0 : i32
    %c0_i32_0 = arith.constant 0 : i32
    %c0_i32_1 = arith.constant 0 : i32
    return %arg0, %c0_i32, %c0_i32_0 : i32, i32, i32
  }
}

</mosaic_0001>

<bundles_post_ra>
// kernel: tpu_custom_call.1
= control target key start
LH: loop header
LB: loop body
LE: loop exit
PB: predicated region body
PF: predicated region fallthrough
CT: control target
= control target key end

     0   :  { %s2629_s0 = inlined_call_operand.hbm [shape: f32[2,8,96], index: 0, kind: input, shape index: {}]   ;;  %s2630_s1 = inlined_call_operand.vmem [shape: f32[96,96], index: 1, kind: input, shape index: {}]   ;;  %s2631_s2 = inlined_call_operand.vmem [shape: f32[32,32], index: 2, kind: input, shape index: {}]   ;;  %s2632_s3 = inlined_call_operand.hbm [shape: f32[2,1,8], index: 3, kind: input, shape index: {}]   ;;  %s2633_s4 = inlined_call_operand.vmem [shape: f32[2,32,8], index: 4, kind: input, shape index: {}]   ;;  %s2634_s5 = inlined_call_operand.hbm [shape: f32[3,32,32], index: 5, kind: input, shape index: {}]   ;;  %s2635_s6 = inlined_call_operand.hbm [shape: f32[3,32,64], index: 6, kind: input, shape index: {}]   ;;  %s2636_s7 = inlined_call_operand.hbm [shape: f32[3,8,8], index: 7, kind: input, shape index: {}]   ;;  %s2637_s8 = inlined_call_operand.vmem [shape: f32[32,1], index: 8, kind: input, shape index: {}]   ;;  %s2638_s9 = inlined_call_operand.vmem [shape: f32[32,1], index: 9, kind: input, shape index: {}]   ;;  %s2639_s10 = inlined_call_operand.hbm [shape: f32[2,8,32], index: 10, kind: output, shape index: {0}]   ;;  %s2640_s11 = inlined_call_operand.vmem [shape: f32[2,32,8], index: 11, kind: output, shape index: {1}]  }
   0x1   :  { %2648 = sst [smem:[#allocation23_spill]] %s2634_s5 }
   0x2   :  { %2649 = sst [smem:[#allocation24_spill]] %s2635_s6 }
   0x3   :  { %2650 = sst [smem:[#allocation25_spill]] %s2636_s7 }
   0x4   :  { %2651 = sst [smem:[#allocation26_spill]] %s2639_s10 }
   0x5   :  { %17 = vsyncpa [#allocation3], 0 }
   0x6   :  { %19 = vsyncpa [#allocation3 + $0x1], 0 }
   0x7   :  { %20 = vsyncpa [#allocation6], 0 }
   0x8   :  { %22 = vsyncpa [#allocation6 + $0x1], 0 }
   0x9   :  { %23 = vsyncpa [#allocation9], 0 }
   0xa   :  { %24 = vsyncpa [#allocation4], 0 }
   0xb   :  { %26 = vsyncpa [#allocation4 + $0x1], 0  ;;  %s2180_s17 = smov 0   ;;  %s2182_s18 = smov 0  }
   0xc   :  { %s2184_s19 = smov 0   ;;  %s2186_s20 = smov 0  }
   0xd LB: > { %2652 = sst [smem:[#allocation17_spill]] %s2086_s17  ;;  %s2204_s24 = sadd.s32 4294967295, %s2098_s20   ;;  %s2098_s20 = sphi %s2186_s20, %s2675_s20   ;;  %s2094_s19 = sphi %s2184_s19, %s2677_s19   ;;  %s2090_s18 = sphi %s2182_s18, %s2679_s18   ;;  %s2086_s17 = sphi %s2180_s17, %s2678_s17  }
   0xe   : > { %2653 = sst [smem:[#allocation18_spill]] %s2094_s19  ;;  %p1654_p0 = scmp.ge.s32.totalorder %s2098_s20, 1 }
   0xf   : > { %2654 = sst [smem:[#allocation19_spill]] %s2098_s20  ;;  %p53_p1 = scmp.eq.s32.totalorder %s2204_s24, 0 }
  0x10   : > { %s2655_s5 = sld [smem:[#allocation23_spill]]  ;;  %p314_p2 = scmp.lt.s32.totalorder %s2098_s20, 3 }
  0x11   : > { %s2100_s26 = smov [#allocation7]   ;;  %s2657_s6 = sld [smem:[#allocation24_spill]] }
  0x12   : > { %p2209_p3 = pnand %p1654_p0, %p314_p2  ;;  %s333_s27 = sshll.u32 %s2100_s26, 4  ;;  %s334_s27 = int_to_ptr.vmem [resolvable:$true] %s333_s27 }
  0x13   : > { %s2659_s7 = sld [smem:[#allocation25_spill]]  ;;  %s2101_s16 = smov [#allocation8]  }
  0x14   : > { %p1770_p4 = pneg %p2209_p3  ;;  %s347_s21 = sshll.u32 %s2101_s16, 4  ;;  %s348_s21 = int_to_ptr.vmem [resolvable:$true] %s347_s21 }
  0x15   : > { %s2102_s22 = smov 128   ;;  %s2103_s26 = smov 8  }
  0x16   : > { %s331_s23 = sshll.u32 %s2655_s5, 4  ;;  %p2221_p6 = pnand %p1770_p4, %p53_p1  ;;  %s332_s23 = int_to_ptr.hbm [resolvable:$true] %s331_s23 }
  0x17   : > { %s345_s30 = sshll.u32 %s2657_s6, 4  ;;  %s2104_s28 = smov [#allocation10]   ;;  %s346_s30 = int_to_ptr.hbm [resolvable:$true] %s345_s30 }
  0x18   : > { %1773 = dma.hbm_to_vmem [thread:$0]  (!%p2221_p6), %s332_s23, 1536, %s334_s27, [#allocation6], %s2102_s22, %s2102_s22, %s2103_s26  }
  0x19   : > { %s359_s15 = sshll.u32 %s2659_s7, 4  ;;  %s361_s29 = sshll.u32 %s2104_s28, 4  ;;  %s360_s15 = int_to_ptr.hbm [resolvable:$true] %s359_s15  ;;  %s362_s29 = int_to_ptr.vmem [resolvable:$true] %s361_s29 }
  0x1a   : > { %1776 = dma.hbm_to_vmem [thread:$0]  (!%p2221_p6), %s346_s30, 1536, %s348_s21, [#allocation9], %s2102_s22, %s2102_s22, %s2103_s26  }
  0x1b   : > { %1779 = dma.hbm_to_vmem [thread:$0]  (!%p2221_p6), %s360_s15, 384, %s362_s29, [#allocation9], %s2102_s22, %s2102_s22, %s2103_s26  }
  0x1c   : > { %s1653_s13 = sadd.s32 4294967294, %s2098_s20   ;;  %s2236_s14 = sadd.s32 1, %s2098_s20  }
  0x1d   : > { %2660 = sst [smem:[#allocation20_spill]] %s2236_s14  ;;  %s39_s16 = sadd.s32 1, %s2094_s19 }
  0x1e   : > { %s36_s23 = ssub.s32 %s2098_s20, %s2236_s14  ;;  %p46_p7 = scmp.ne.s32.totalorder %s2094_s19, %s2090_s18 }
  0x1f   : > { %p37_p8 = scmp.eq.s32.totalorder %s36_s23, 0  ;;  %p47_p9 = scmp.eq.s32.totalorder %s2098_s20, 0 }
  0x20   : > { %p52_p10 = scmp.ne.s32.totalorder %s2090_s18, %s2086_s17  ;;  %p275_p11 = scmp.eq.s32.totalorder %s2204_s24, 1 }
  0x21   : > { %s2248_s27 = scalar_select %p37_p8, %s2094_s19, %s39_s16  }
  0x22   : > { %p2250_p12 = por %p47_p9, %p46_p7  ;;  %p2256_p13 = por %p53_p1, %p52_p10 }
  0x23   : > { %2661 = sst [smem:[#allocation21_spill]] %s2248_s27  ;;  %p2260_p0 = por %p275_p11, %p46_p7 }
  0x24   : > { %p281_p2 = scmp.eq.s32.totalorder %s1653_s13, 1  ;;  %p1794_p4 = scmp.lt.s32.totalorder %s2098_s20, 2 }
  0x25   : > { %s2266_s21 = sand.u32 1, %s2094_s19   ;;  %s1660_s28 = sshll.u32 %s2098_s20, 3 }
  0x26   : > { %p2268_p6 = por %p281_p2, %p52_p10  ;;  %s1659_s26 = sshll.u32 %s2266_s21, 3 }
  0x27   : > { %s389_s23 = scalar_lea.hbm %s2629_s0, %s1660_s28  ;;  %s385_s6 = scalar_lea.vmem [#allocation2], %s1659_s26 }
  0x28   : > { %s2665_s22 = scalar_select %p2268_p6, 1, 0 }
  0x29   : > { %s391_s5 = sshll.u32 %s389_s23, 4  ;;  %s393_s7 = sshll.u32 %s385_s6, 4  ;;  %s392_s5 = int_to_ptr.hbm [resolvable:$true] %s391_s5  ;;  %s394_s7 = int_to_ptr.vmem [resolvable:$true] %s393_s7 }
  0x2a   : > { %2666 = sst [smem:[#allocation22_spill]] %s2665_s22  ;;  %p2279_p7 = pnand %p1794_p4, %p2250_p12 }
  0x2b   : > { %s400_s27 = sand.u32 1, %s2098_s20   ;;  %s406_s22 = scalar_lea.hbm %s2632_s3, %s2098_s20 }
  0x2c   : > { %s382_s17 = scalar_lea.sflag [#allocation3], %s2266_s21  ;;  %s1960_s29 = sshra.s32 %s392_s5, 4  ;;  %s1961_s29 = int_to_ptr.hbm [resolvable:$true] %s1960_s29 }
  0x2d   : > { %s1962_s28 = scalar_lea.hbm %s1961_s29, 8  ;;  %p1964_p9 = pneg %p2279_p7 }
  0x2e   : > { %p1963_p8 = scmp.ne.s32.totalorder %s1961_s29, %s1962_s28  ;;  %s1967_s26 = scalar_lea.hbm %s2629_s0, 16 }
  0x2f   : > { %p1968_p12 = scmp.lt.s32.totalorder %s1961_s29, %s2629_s0  ;;  %p1969_p2 = scmp.lt.s32.totalorder %s1967_s26, %s1962_s28 }
  0x30   : > { %p1965_p10 = pnand %p1964_p9, %p1963_p8 }
  0x31   : > { %p1970_p4 = por %p1969_p2, %p1968_p12 }
  0x32   : > { %p1966_p11 = pneg %p1965_p10 }
  0x34   : > { %p1971_p5 = pnand %p1970_p4, %p1966_p11 }
  0x36   : > { %1974 = shalt.err (!%p1971_p5)
}
  0x37   : > { %1783 = dma.hbm_to_vmem [thread:$0]  (!%p2279_p7), %s392_s5, 128, %s394_s7, %s382_s17  }
  0x38   : > { %s408_s19 = sshll.u32 %s406_s22, 4  ;;  %s403_s14 = scalar_lea.vmem [#allocation5], %s2266_s21  ;;  %s409_s19 = int_to_ptr.hbm [resolvable:$true] %s408_s19 }
  0x39   : > { %s410_s20 = sshll.u32 %s403_s14, 4  ;;  %s401_s6 = scalar_lea.sflag [#allocation6], %s400_s27  ;;  %s411_s20 = int_to_ptr.vmem [resolvable:$true] %s410_s20 }
  0x3a   : > { %s1990_s30 = sshra.s32 %s409_s19, 4  ;;  %s1997_s26 = scalar_lea.hbm %s2632_s3, 2  ;;  %s1991_s30 = int_to_ptr.hbm [resolvable:$true] %s1990_s30 }
  0x3b   : > { %s1992_s10 = scalar_lea.hbm %s1991_s30, 1  ;;  %p1998_p5 = scmp.lt.s32.totalorder %s1991_s30, %s2632_s3 }
  0x3c   : > { %p1993_p8 = scmp.ne.s32.totalorder %s1991_s30, %s1992_s10  ;;  %p1999_p12 = scmp.lt.s32.totalorder %s1997_s26, %s1992_s10 }
  0x3e   : > { %p1995_p10 = pnand %p1993_p8, %p1964_p9  ;;  %p2000_p2 = por %p1999_p12, %p1998_p5 }
  0x40   : > { %p1996_p11 = pneg %p1995_p10 }
  0x42   : > { %p2001_p4 = pnand %p2000_p2, %p1996_p11 }
  0x44   : > { %2004 = shalt.err (!%p2001_p4)
}
  0x45   : > { %1786 = dma.hbm_to_vmem [thread:$0]  (!%p2279_p7), %s409_s19, 16, %s411_s20, %s401_s6  }
  0x46   : > { %427 = sbr.rel (%p2209_p3) target bundleno = 1866 (0x74a), region = 60  ;;  %s2317_s7 = sand.u32 (!%p2209_p3), 1, %s2090_s18  }
  0x47   : > { %s1662_s17 = sshll.u32 (!%p2209_p3), %s2317_s7, 3  ;;  %s430_s27 = scalar_lea.sflag (!%p2209_p3), [#allocation3], %s2317_s7 }
  0x48   : > { %s2323_s10 = scalar_lea.vmem (!%p2209_p3), [#allocation2], %s1662_s17 }
  0x4b   : > { %2065 = dma.done.wait (%p2256_p13), %s430_s27, 128  }
  0x4c   : > { %2067 = vsyncadd (%p2256_p13), %s430_s27, 4294967168  ;;  %s439_s20 = sand.u32 1, %s2204_s24   ;;  %s442_s21 = scalar_lea.vmem [#allocation5], %s2317_s7 }
  0x4d   : > { %s440_s25 = scalar_lea.sflag [#allocation6], %s439_s20 }
  0x4e   : > { %2069 = dma.done.wait (%p2256_p13), %s440_s25, 16  }
  0x4f   : > { %2071 = vsyncadd (%p2256_p13), %s440_s25, 4294967280 }
  0x50   : > { %2073 = dma.done.wait (%p53_p1), [#allocation6], 1536  }
  0x51   : > { %2075 = vsyncadd (%p53_p1), [#allocation6], 4294965760 }
  0x52   : > { %2077 = dma.done.wait (%p53_p1), [#allocation9], 1920  }
  0x53   : > { %2079 = vsyncadd (%p53_p1), [#allocation9], 4294965376  ;;  %v533_v0 = vld [vmem:[%s2630_s1 + $0x58] sm:$0xff]  ;;  %v532_v1 = vld [vmem:[%s2630_s1 + $0x50] sm:$0xff]  ;;  %vm534_vm0 = vcmask 785408   ;;  %p511_p1 = scmp.lt.s32.totalorder %s2204_s24, 1 }
  0x54   : > { %542 = vmatpush.msra.mxu0 %v533_v0  ;;  %v531_v2 = vld [vmem:[%s2630_s1 + $0x48] sm:$0xff]  ;;  %v530_v3 = vld [vmem:[%s2630_s1 + $0x40] sm:$0xff]  ;;  %v529_v4 = vld [vmem:[%s2630_s1 + $0x38] sm:$0xff]  ;;  %vm561_vm1 = vcmask 64512   ;;  %s2106_s27 = smov 112   ;;  %s2107_s20 = smov 96  }
  0x55   : > { %v528_v5 = vld [vmem:[%s2630_s1 + $0x30] sm:$0xff]  ;;  %v527_v6 = vld [vmem:[%s2630_s1 + $0x28] sm:$0xff]  ;;  %v526_v7 = vld [vmem:[%s2630_s1 + $0x20] sm:$0xff]  ;;  %s2382_s29 = scalar_select %p511_p1, %s2204_s24, 1  ;;  %vm756_vm2 = vcmask 261120   ;;  %v2112_v40 = vmov 0  }
  0x56   : > { %543 = vmatpush.msra.mxu0 %v532_v1  ;;  %v525_v8 = vld [vmem:[%s2630_s1 + $0x18] sm:$0xff]  ;;  %v524_v9 = vld [vmem:[%s2630_s1 + $0x10] sm:$0xff]  ;;  %v523_v10 = vld [vmem:[%s2630_s1 + $0x8] sm:$0xff]  ;;  %s2108_s25 = smov 88   ;;  %s2109_s22 = smov 72   ;;  %1851 = vset.pattern.permute.xlu1 %v2112_v40  ;;  %vm1063_vm3 = vcmask 523264  }
  0x57   : > { %v522_v11 = vld [vmem:[%s2630_s1] sm:$0xff]  ;;  %s1749_s28 = sshll.u32 %s2382_s29, 5  ;;  %v2390_v13 = vld [vmem:[#allocation10] sm:$0xff]  ;;  %s2110_s13 = smov 80   ;;  %1853 = vset.pattern.permute.xlu0 %v2112_v40  ;;  %1852 = vset.pattern.permute.xlu2 %v2112_v40  ;;  %v1238_v49 = vld [vmem:[%s2638_s9 + $0x8] sm:$0xff]  ;;  %vm1443_vm6 = vcmask 130048  }
  0x58   : > { %544 = vmatpush.msra.mxu0 %v531_v2  ;;  %v521_v12 = vld [vmem:[%s2323_s10] sm:$0xff]  ;;  %s515_s5 = scalar_lea.vmem %s2633_s4, %s1749_s28  ;;  %1751 = vmatpush.msra.mxu2 %v2390_v13  ;;  %s2105_s10 = smov 104   ;;  %v871_v38 = vld [vmem:[#allocation7 + $0x40] sm:$0xff]  ;;  %vm1445_vm7 = vcmask 195584  }
  0x59   : > { %v672_v14 = vld [vmem:[%s515_s5 + $0x10] sm:$0xff]  ;;  %s2111_s23 = smov 120   ;;  %v673_v16 = vld [vmem:[%s515_s5 + $0x18] sm:$0xff]  ;;  %v2404_v17 = vld [vmem:[#allocation10 + $0x10] sm:$0xff]  ;;  %s2113_s12 = smov 64  }
  0x5a   : > { %545 = vmatpush.msra.mxu0 %v530_v3  ;;  %1682 = vmatmul.msk.f32.vlgmr.msra.gmra.mxu2 %vm561_vm1, %v672_v14  ;;  %v670_v18 = vld [vmem:[%s515_s5] sm:$0xff]  ;;  %v671_v19 = vld [vmem:[%s515_s5 + $0x8] sm:$0xff]  ;;  %v716_v44 = vld [vmem:[#allocation7] sm:$0xff]  ;;  %s2114_s14 = smov 40   ;;  %s2115_s6 = smov 56  }
  0x5b   : > { %856 = vmatpush.msrb.mxu2 %v2404_v17  ;;  %v721_v25 = vld [vmem:[#allocation10 + $0x8] sm:$0xff]  ;;  %v873_v47 = vld [vmem:[#allocation7 + $0x50] sm:$0xff]  ;;  %v874_v51 = vld [vmem:[#allocation7 + $0x58] sm:$0xff]  ;;  %s2116_s30 = smov 48   ;;  %s520_s5 = scalar_lea.vmem %s2640_s11, %s1749_s28 }
  0x5c   : > { %546 = vmatpush.msra.mxu0 %v529_v4  ;;  %v920_v39 = vld [vmem:[%s2637_s8] sm:$0xff]  ;;  %v923_v45 = vld [vmem:[%s2637_s8 + $0x18] sm:$0xff]  ;;  %v922_v53 = vld [vmem:[%s2637_s8 + $0x10] sm:$0xff]  ;;  %s2118_s29 = smov 8   ;;  %s2119_s28 = smov 24  }
  0x5d   : > { %v872_v43 = vld [vmem:[#allocation7 + $0x48] sm:$0xff]  ;;  %v718_v52 = vld [vmem:[#allocation7 + $0x10] sm:$0xff]  ;;  %v719_v55 = vld [vmem:[#allocation7 + $0x18] sm:$0xff]  ;;  %s503_s16 = scalar_lea.vmem [#allocation11], %s1662_s17 }
  0x5e   : > { %547 = vmatpush.msra.mxu0 %v528_v5  ;;  %v717_v48 = vld [vmem:[#allocation7 + $0x8] sm:$0xff]  ;;  %v752_v56 = vld [vmem:[#allocation7 + $0x20] sm:$0xff]  ;;  %v921_v57 = vld [vmem:[%s2637_s8 + $0x8] sm:$0xff] }
  0x5f   : > { %v1240_v58 = vld [vmem:[%s2638_s9 + $0x18] sm:$0xff]  ;;  %v1237_v59 = vld [vmem:[%s2638_s9] sm:$0xff]  ;;  %v1239_v61 = vld [vmem:[%s2638_s9 + $0x10] sm:$0xff] }
  0x60   : > { %548 = vmatpush.msra.mxu0 %v527_v6  ;;  %v753_v60 = vld [vmem:[#allocation7 + $0x28] sm:$0xff]  ;;  %v754_v63 = vld [vmem:[#allocation7 + $0x30] sm:$0xff]  ;;  %v755_v0 = vld [vmem:[#allocation7 + $0x38] sm:$0xff] }
  0x62   : > { %549 = vmatpush.msra.mxu0 %v526_v7  ;;  %1683 = vmatmul.msk.f32.gmra.mxu2 %vm561_vm1, %v673_v16 }
  0x64   : > { %550 = vmatpush.msra.mxu0 %v525_v8 }
  0x66   : > { %551 = vmatpush.msra.mxu0 %v524_v9 }
  0x68   : > { %552 = vmatpush.msra.mxu0 %v523_v10 }
  0x6a   : > { %553 = vmatpush.msra.mxu0 %v522_v11  ;;  %1696 = vmatmul.msk.f32.vlgmr.msrb.gmra.mxu2 %vm561_vm1, %v670_v18 }
  0x6b   : > { %1671 = vmatmul.msk.f32.vlgmr.msra.gmra.mxu0 %vm534_vm0, %v521_v12 }
  0x72   : > { %1697 = vmatmul.msk.f32.gmra.mxu2 %vm561_vm1, %v671_v19 }
  0x7a   : > { %1698 = vmatmul.msk.f32.gmra.mxu2 %vm561_vm1, %v672_v14 }
  0x82   : > { %1699 = vmatmul.msk.f32.gmra.mxu2 %vm561_vm1, %v673_v16 }
  0xdd   : > { %v710_v28 = vpop.f32.mrf.mxu2 }
  0xe5   : > { %v713_v29 = vpop.f32.mrf.mxu2 }
  0xe8   : > { %v2394_v15 = vpop.f32.mrf.mxu0 }
  0xe9   : > { %642 = vrot.lane.b32.xlu2 %v2394_v15, %s2105_s10  ;;  %614 = vrot.lane.b32.xlu1 %v2394_v15, %s2106_s27 }
  0xea   : > { %559 = vrot.lane.b32.xlu0 %v2394_v15, %s2107_s20 }
  0xed   : > { %v858_v30 = vpop.f32.mrf.mxu2 }
  0xf1   : > { %588 = vrot.lane.b32.xlu2 %v2394_v15, %s2108_s25  ;;  %644 = vrot.lane.b32.xlu1 %v2394_v15, %s2109_s22 }
  0xf2   : > { %616 = vrot.lane.b32.xlu0 %v2394_v15, %s2110_s13 }
  0xf5   : > { %v861_v31 = vpop.f32.mrf.mxu2 }
  0xf9   : > { %926 = vperm.xlu1 %1851, %v920_v39   ;;  %931 = vperm.xlu2 %1852, %v921_v57   ;;  %v1062_v57 = vld [vmem:[#allocation8 + $0x38] sm:$0xff] }
  0xfa   : > { %586 = vrot.lane.b32.xlu0 %v2394_v15, %s2111_s23 }
  0xfd   : > { %v864_v32 = vpop.f32.mrf.mxu2 }
 0x101   : > { %941 = vperm.xlu1 %1851, %v923_v45   ;;  %1243 = vperm.xlu2 %1852, %v1237_v59  }
 0x102   : > { %936 = vperm.xlu0 %1853, %v922_v53   ;;  %v1060_v53 = vld [vmem:[#allocation8 + $0x28] sm:$0xff] }
 0x105   : > { %v867_v33 = vpop.f32.mrf.mxu2 }
 0x109   : > { %1248 = vperm.xlu1 %1851, %v1238_v49   ;;  %1253 = vperm.xlu2 %1852, %v1239_v61  }
 0x10a   : > { %1258 = vperm.xlu0 %1853, %v1240_v58   ;;  %v1016_v58 = vld [vmem:[#allocation8 + $0x18] sm:$0xff] }
 0x143   : > { %v643_v20 = vpop.permute.xlu2 %642 }
 0x14b   : > { %v589_v21 = vpop.permute.xlu2 %588 }
 0x14c   : > { %1674 = vmatpush.xpose.msk.msrb.mxu0 %vm561_vm1, %v589_v21 }
 0x150   : > { %822 = vmatpush.msra.mxu0 %v713_v29 }
 0x152   : > { %823 = vmatpush.msra.mxu0 %v710_v28 }
 0x15b   : > { %v615_v22 = vpop.permute.xlu1 %614 }
 0x15c   : > { %v560_v23 = vpop.permute.xlu0 %559 }
 0x15d   : > { %1672 = vmatpush.xpose.msk.msra.mxu3 %vm561_vm1, %v560_v23 }
 0x160   : > { %1673 = vmatmul.msk.f32.vlgmr.msra.gmra.mxu3 %vm561_vm1, %v2394_v15 }
 0x163   : > { %v645_v24 = vpop.permute.xlu1 %644 }
 0x164   : > { %v617_v26 = vpop.permute.xlu0 %616  ;;  %1678 = vmatpush.xpose.msk.msra.mxu1 %vm561_vm1, %v645_v24 }
 0x165   : > { %1676 = vmatpush.xpose.msk.msrb.mxu3 %vm561_vm1, %v617_v26 }
 0x167   : > { %1679 = vmatmul.msk.f32.vlgmr.msra.gmra.mxu1 %vm561_vm1, %v643_v20 }
 0x168   : > { %702 = vmatpush.msrb.mxu1 %v2390_v13  ;;  %1677 = vmatmul.msk.f32.vlgmr.msrb.gmra.mxu3 %vm561_vm1, %v615_v22 }
 0x169   : > { %737 = vmatpush.msra.mxu3 %v721_v25 }
 0x16b   : > { %899 = vmatpush.msrb.mxu3 %v867_v33  ;;  %v927_v8 = vpop.permute.xlu1 %926 }
 0x16c   : > { %v587_v27 = vpop.permute.xlu0 %586 }
 0x16d   : > { %1675 = vmatmul.msk.f32.vlgmr.msrb.gmra.mxu0 %vm561_vm1, %v587_v27  ;;  %900 = vmatpush.msrb.mxu3 %v864_v32 }
 0x16f   : > { %1680 = vmatmul.msk.f32.vlgmr.msrb.gmra.mxu1 %vm561_vm1, %v670_v18  ;;  %901 = vmatpush.msrb.mxu3 %v861_v31 }
 0x170   : > { %1684 = vmatmul.msk.f32.vlgmr.msra.gmra.mxu3 %vm561_vm1, %v670_v18 }
 0x171   : > { %902 = vmatpush.msrb.mxu3 %v858_v30 }
 0x173   : > { %v942_v29 = vpop.permute.xlu1 %941 }
 0x174   : > { %v937_v22 = vpop.permute.xlu0 %936 }
 0x177   : > { %1681 = vmatmul.msk.f32.gmra.mxu1 %vm561_vm1, %v671_v19 }
 0x178   : > { %1685 = vmatmul.msk.f32.gmra.mxu3 %vm561_vm1, %v671_v19 }
 0x180   : > { %1686 = vmatmul.msk.f32.gmra.mxu3 %vm561_vm1, %v672_v14 }
 0x188   : > { %1687 = vmatmul.msk.f32.gmra.mxu3 %vm561_vm1, %v673_v16 }
 0x190   : > { %1700 = vmatmul.msk.f32.vlgmr.msrb.gmra.mxu3 %vm756_vm2, %v871_v38 }
 0x198   : > { %1701 = vmatmul.msk.f32.gmra.mxu3 %vm756_vm2, %v872_v43 }
 0x1a0   : > { %1702 = vmatmul.msk.f32.gmra.mxu3 %vm756_vm2, %v873_v47 }
 0x1a8   : > { %1703 = vmatmul.msk.f32.gmra.mxu3 %vm756_vm2, %v874_v51  ;;  %v1059_v51 = vld [vmem:[#allocation8 + $0x20] sm:$0xff] }
 0x1e3   : > { %v2427_v34 = vpop.f32.mrf.mxu3 }
 0x1e4   : > { %v2429_v35 = vpop.f32.mrf.mxu1 }
 0x1ea   : > { %v2473_v62 = vpop.f32.mrf.mxu0 }
 0x1eb   : > { %v2431_v36 = vpop.f32.mrf.mxu3 }
 0x1ec   : > { %v704_v37 = vpop.f32.mrf.mxu1 }
 0x1f3   : > { %v739_v41 = vpop.f32.mrf.mxu3 }
 0x1f4   : > { %v707_v42 = vpop.f32.mrf.mxu1 }
 0x1f5   : > { %824 = vmatpush.msra.mxu0 %v707_v42 }
 0x1f7   : > { %825 = vmatpush.msra.mxu0 %v704_v37 }
 0x1f8   : > { %1692 = vmatmul.msk.f32.vlgmr.msra.gmra.mxu0 %vm756_vm2, %v716_v44 }
 0x1f9   : > { %1032 = vmatpush.msrb.mxu0 %v721_v25 }
 0x1fb   : > { %v742_v46 = vpop.f32.mrf.mxu3 }
 0x200   : > { %1693 = vmatmul.msk.f32.gmra.mxu0 %vm756_vm2, %v717_v48 }
 0x203   : > { %v745_v50 = vpop.f32.mrf.mxu3 }
 0x208   : > { %1694 = vmatmul.msk.f32.gmra.mxu0 %vm756_vm2, %v718_v52  ;;  %v1013_v52 = vld [vmem:[#allocation8] sm:$0xff] }
 0x20b   : > { %v748_v54 = vpop.f32.mrf.mxu3 }
 0x20c   : > { %781 = vmatpush.msra.mxu1 %v748_v54  ;;  %v1014_v54 = vld [vmem:[#allocation8 + $0x8] sm:$0xff] }
 0x20e   : > { %782 = vmatpush.msra.mxu1 %v745_v50 }
 0x210   : > { %783 = vmatpush.msra.mxu1 %v742_v46  ;;  %1695 = vmatmul.msk.f32.gmra.mxu0 %vm756_vm2, %v719_v55  ;;  %v1061_v55 = vld [vmem:[#allocation8 + $0x30] sm:$0xff] }
 0x212   : > { %784 = vmatpush.msra.mxu1 %v739_v41 }
 0x213   : > { %1688 = vmatmul.msk.f32.vlgmr.msra.gmra.mxu1 %vm756_vm2, %v752_v56  ;;  %v904_v1 = vpop.f32.mrf.mxu3  ;;  %v1015_v56 = vld [vmem:[#allocation8 + $0x10] sm:$0xff] }
 0x214   : > { %987 = vmatpush.msrb.mxu1 %v2390_v13  ;;  %v932_v13 = vpop.permute.xlu2 %931 }
 0x218   : > { %1712 = vmatmul.msk.f32.vlgmr.msrb.gmra.mxu0 %vm561_vm1, %v2427_v34 }
 0x21b   : > { %1689 = vmatmul.msk.f32.gmra.mxu1 %vm756_vm2, %v753_v60  ;;  %v907_v6 = vpop.f32.mrf.mxu3 }
 0x220   : > { %1713 = vmatmul.msk.f32.gmra.mxu0 %vm561_vm1, %v2473_v62 }
 0x223   : > { %1690 = vmatmul.msk.f32.gmra.mxu1 %vm756_vm2, %v754_v63  ;;  %v910_v16 = vpop.f32.mrf.mxu3 }
 0x228   : > { %1714 = vmatmul.msk.f32.gmra.mxu0 %vm561_vm1, %v2431_v36 }
 0x22b   : > { %1691 = vmatmul.msk.f32.gmra.mxu1 %vm756_vm2, %v755_v0  ;;  %v913_v24 = vpop.f32.mrf.mxu3 }
 0x230   : > { %1715 = vmatmul.msk.f32.gmra.mxu0 %vm561_vm1, %v2429_v35 }
 0x233   : > { %1704 = vmatmul.msk.f32.vlgmr.msrb.gmra.mxu1 %vm561_vm1, %v2427_v34 }
 0x23b   : > { %1705 = vmatmul.msk.f32.gmra.mxu1 %vm561_vm1, %v2473_v62 }
 0x243   : > { %1706 = vmatmul.msk.f32.gmra.mxu1 %vm561_vm1, %v2431_v36 }
 0x24b   : > { %1707 = vmatmul.msk.f32.gmra.mxu1 %vm561_vm1, %v2429_v35 }
 0x275   : > { %v827_v2 = vpop.f32.mrf.mxu0 }
 0x27d   : > { %v830_v7 = vpop.f32.mrf.mxu0 }
 0x285   : > { %v833_v18 = vpop.f32.mrf.mxu0 }
 0x28d   : > { %v836_v25 = vpop.f32.mrf.mxu0 }
 0x290   : > { %v786_v3 = vpop.f32.mrf.mxu1 }
 0x291   : > { %v828_v4 = vadd.f32 %v827_v2, %v786_v3  ;;  %v1188_v3 = vld [vmem:[#allocation8 + $0x40] sm:$0xff] }
 0x293   : > { %v916_v5 = vadd.f32 %v904_v1, %v828_v4  ;;  %v1189_v4 = vld [vmem:[#allocation8 + $0x48] sm:$0xff] }
 0x295   : > { %v2491_v9 = vadd.f32 %v927_v8, %v916_v5  ;;  %v1034_v31 = vpop.f32.mrf.mxu0  ;;  %v1190_v5 = vld [vmem:[#allocation8 + $0x50] sm:$0xff] }
 0x297   : > { %1708 = vmatmul.msk.f32.gmra.mxu1 %vm561_vm1, %v2491_v9  ;;  %1716 = vmatmul.msk.f32.gmra.mxu0 %vm561_vm1, %v2491_v9 }
 0x298   : > { %v789_v10 = vpop.f32.mrf.mxu1 }
 0x299   : > { %v831_v11 = vadd.f32 %v830_v7, %v789_v10 }
 0x29b   : > { %v917_v12 = vadd.f32 %v907_v6, %v831_v11  ;;  %v1191_v6 = vld [vmem:[#allocation8 + $0x58] sm:$0xff] }
 0x29d   : > { %v2497_v14 = vadd.f32 %v932_v13, %v917_v12  ;;  %v1037_v33 = vpop.f32.mrf.mxu0 }
 0x29f   : > { %1709 = vmatmul.msk.f32.gmra.mxu1 %vm561_vm1, %v2497_v14  ;;  %1717 = vmatmul.msk.f32.gmra.mxu0 %vm561_vm1, %v2497_v14 }
 0x2a0   : > { %v792_v19 = vpop.f32.mrf.mxu1 }
 0x2a1   : > { %v834_v20 = vadd.f32 %v833_v18, %v792_v19 }
 0x2a3   : > { %v918_v21 = vadd.f32 %v910_v16, %v834_v20 }
 0x2a5   : > { %v2503_v23 = vadd.f32 %v937_v22, %v918_v21  ;;  %v1040_v38 = vpop.f32.mrf.mxu0 }
 0x2a7   : > { %1710 = vmatmul.msk.f32.gmra.mxu1 %vm561_vm1, %v2503_v23  ;;  %1718 = vmatmul.msk.f32.gmra.mxu0 %vm561_vm1, %v2503_v23 }
 0x2a8   : > { %v795_v26 = vpop.f32.mrf.mxu1 }
 0x2a9   : > { %v837_v27 = vadd.f32 %v836_v25, %v795_v26 }
 0x2ab   : > { %v919_v28 = vadd.f32 %v913_v24, %v837_v27 }
 0x2ad   : > { %v947_v30 = vadd.f32 %v942_v29, %v919_v28  ;;  %v1043_v41 = vpop.f32.mrf.mxu0 }
 0x2af   : > { %1711 = vmatmul.msk.f32.gmra.mxu1 %vm561_vm1, %v947_v30  ;;  %1719 = vmatmul.msk.f32.gmra.mxu0 %vm561_vm1, %v947_v30 }
 0x2b0   : > { %v989_v32 = vpop.f32.mrf.mxu1 }
 0x2b8   : > { %v992_v37 = vpop.f32.mrf.mxu1 }
 0x2c0   : > { %v995_v39 = vpop.f32.mrf.mxu1 }
 0x2c8   : > { %v998_v42 = vpop.f32.mrf.mxu1 }
 0x314   : > { %v1001_v43 = vpop.f32.mrf.mxu1  ;;  %v1046_v44 = vpop.f32.mrf.mxu0 }
 0x31c   : > { %v1004_v45 = vpop.f32.mrf.mxu1  ;;  %v1049_v46 = vpop.f32.mrf.mxu0 }
 0x324   : > { %v1007_v47 = vpop.f32.mrf.mxu1  ;;  %v1052_v48 = vpop.f32.mrf.mxu0 }
 0x32c   : > { %v1010_v49 = vpop.f32.mrf.mxu1  ;;  %v1055_v50 = vpop.f32.mrf.mxu0 }
 0x32d   : > { %1084 = vmatpush.msra.mxu2 %v1055_v50  ;;  %1125 = vmatpush.msra.mxu3 %v1010_v49 }
 0x32f   : > { %1085 = vmatpush.msra.mxu2 %v1052_v48  ;;  %1126 = vmatpush.msra.mxu3 %v1007_v47 }
 0x331   : > { %1086 = vmatpush.msra.mxu2 %v1049_v46  ;;  %1127 = vmatpush.msra.mxu3 %v1004_v45 }
 0x333   : > { %1087 = vmatpush.msra.mxu2 %v1046_v44  ;;  %1128 = vmatpush.msra.mxu3 %v1001_v43 }
 0x335   : > { %1088 = vmatpush.msra.mxu2 %v1043_v41  ;;  %1129 = vmatpush.msra.mxu3 %v998_v42  ;;  %v1259_v41 = vpop.permute.xlu0 %1258 }
 0x337   : > { %1089 = vmatpush.msra.mxu2 %v1040_v38  ;;  %1130 = vmatpush.msra.mxu3 %v995_v39 }
 0x339   : > { %1090 = vmatpush.msra.mxu2 %v1037_v33  ;;  %1131 = vmatpush.msra.mxu3 %v992_v37 }
 0x33b   : > { %1091 = vmatpush.msra.mxu2 %v1034_v31  ;;  %1132 = vmatpush.msra.mxu3 %v989_v32 }
 0x33c   : > { %1720 = vmatmul.msk.f32.vlgmr.msra.gmra.mxu2 %vm1063_vm3, %v1059_v51  ;;  %1724 = vmatmul.msk.f32.vlgmr.msra.gmra.mxu3 %vm1063_vm3, %v1013_v52 }
 0x33d   : > { %1161 = vmatpush.msrb.mxu2 %v2404_v17 }
 0x344   : > { %1721 = vmatmul.msk.f32.gmra.mxu2 %vm1063_vm3, %v1060_v53  ;;  %1725 = vmatmul.msk.f32.gmra.mxu3 %vm1063_vm3, %v1014_v54 }
 0x34c   : > { %1722 = vmatmul.msk.f32.gmra.mxu2 %vm1063_vm3, %v1061_v55  ;;  %1726 = vmatmul.msk.f32.gmra.mxu3 %vm1063_vm3, %v1015_v56 }
 0x354   : > { %1723 = vmatmul.msk.f32.gmra.mxu2 %vm1063_vm3, %v1062_v57  ;;  %1727 = vmatmul.msk.f32.gmra.mxu3 %vm1063_vm3, %v1016_v58 }
 0x35c   : > { %1728 = vmatmul.msk.f32.vlgmr.msrb.gmra.mxu2 %vm561_vm1, %v2427_v34 }
 0x364   : > { %1729 = vmatmul.msk.f32.gmra.mxu2 %vm561_vm1, %v2473_v62 }
 0x36c   : > { %1730 = vmatmul.msk.f32.gmra.mxu2 %vm561_vm1, %v2431_v36 }
 0x374   : > { %1731 = vmatmul.msk.f32.gmra.mxu2 %vm561_vm1, %v2429_v35 }
 0x37c   : > { %1732 = vmatmul.msk.f32.gmra.mxu2 %vm561_vm1, %v2491_v9 }
 0x384   : > { %1733 = vmatmul.msk.f32.gmra.mxu2 %vm561_vm1, %v2497_v14  ;;  %v1244_v14 = vpop.permute.xlu2 %1243 }
 0x38c   : > { %1734 = vmatmul.msk.f32.gmra.mxu2 %vm561_vm1, %v2503_v23  ;;  %v1249_v23 = vpop.permute.xlu1 %1248 }
 0x394   : > { %1735 = vmatmul.msk.f32.gmra.mxu2 %vm561_vm1, %v947_v30  ;;  %v1254_v30 = vpop.permute.xlu2 %1253 }
 0x3bf   : > { %v1093_v17 = vpop.f32.mrf.mxu2  ;;  %v1134_v7 = vpop.f32.mrf.mxu3 }
 0x3c0   : > { %v1135_v11 = vadd.f32 %v1134_v7, %v1093_v17 }
 0x3c7   : > { %v1096_v34 = vpop.f32.mrf.mxu2  ;;  %v1137_v8 = vpop.f32.mrf.mxu3 }
 0x3c8   : > { %v1138_v19 = vadd.f32 %v1137_v8, %v1096_v34 }
 0x3cf   : > { %v1099_v59 = vpop.f32.mrf.mxu2  ;;  %v1140_v9 = vpop.f32.mrf.mxu3 }
 0x3d0   : > { %v1141_v26 = vadd.f32 %v1140_v9, %v1099_v59 }
 0x3d7   : > { %v1102_v60 = vpop.f32.mrf.mxu2  ;;  %v1143_v10 = vpop.f32.mrf.mxu3 }
 0x3d8   : > { %v1144_v33 = vadd.f32 %v1143_v10, %v1102_v60 }
 0x3df   : > { %v1163_v61 = vpop.f32.mrf.mxu2 }
 0x3e7   : > { %v1166_v36 = vpop.f32.mrf.mxu2 }
 0x3ef   : > { %v1169_v62 = vpop.f32.mrf.mxu2 }
 0x3f7   : > { %v1172_v63 = vpop.f32.mrf.mxu2 }
 0x3ff   : > { %v1175_v35 = vpop.f32.mrf.mxu2 }
 0x407   : > { %v1178_v0 = vpop.f32.mrf.mxu2 }
 0x40f   : > { %v1181_v1 = vpop.f32.mrf.mxu2 }
 0x417   : > { %v1184_v2 = vpop.f32.mrf.mxu2 }
 0x418   : > { %1212 = vmatpush.msrb.mxu3 %v1184_v2 }
 0x41a   : > { %1213 = vmatpush.msrb.mxu3 %v1181_v1 }
 0x41c   : > { %1214 = vmatpush.msrb.mxu3 %v1178_v0 }
 0x41e   : > { %1215 = vmatpush.msrb.mxu3 %v1175_v35 }
 0x420   : > { %1216 = vmatpush.msrb.mxu3 %v1172_v63  ;;  %v1313_v63 = vld [vmem:[%s442_s21] sm:$0x1]  ;;  %s2117_s21 = smov 16  }
 0x421   : > { %vm1314_vm4 = vcmp.eq.f32.partialorder %v1313_v63, 0.0 }
 0x422   : > { %1217 = vmatpush.msrb.mxu3 %v1169_v62  ;;  %v1315_v35 = vsel %vm1314_vm4, 1, %v2112_v40 }
 0x423   : > { %v1316_v1 = vperm.slane %v1315_v35, 0 }
 0x424   : > { %1218 = vmatpush.msrb.mxu3 %v1166_v36 }
 0x425   : > { %vm2554_vm5 = vcmp.eq.s32.totalorder %v1316_v1, 1 }
 0x426   : > { %1219 = vmatpush.msrb.mxu3 %v1163_v61 }
 0x427   : > { %1736 = vmatmul.msk.f32.vlgmr.msrb.gmra.mxu3 %vm1063_vm3, %v1188_v3 }
 0x42f   : > { %1737 = vmatmul.msk.f32.gmra.mxu3 %vm1063_vm3, %v1189_v4 }
 0x437   : > { %1738 = vmatmul.msk.f32.gmra.mxu3 %vm1063_vm3, %v1190_v5 }
 0x43f   : > { %1739 = vmatmul.msk.f32.gmra.mxu3 %vm1063_vm3, %v1191_v6 }
 0x4aa   : > { %v1221_v12 = vpop.f32.mrf.mxu3 }
 0x4ab   : > { %v1233_v13 = vadd.f32 %v1221_v12, %v1135_v11 }
 0x4ad   : > { %v1261_v16 = vadd.f32 %v1244_v14, %v1233_v13 }
 0x4af   : > { %v1265_v18 = vmul.f32 0.17677669, %v1261_v16 }
 0x4b1   : > { %v1269_v20 = vsel %vm561_vm1, %v1265_v18, -inf }
 0x4b2   : > { %v1224_v21 = vpop.f32.mrf.mxu3  ;;  %1270 = vmax.xlane.f32.xlu1 %v1269_v20 }
 0x4b3   : > { %v1234_v22 = vadd.f32 %v1224_v21, %v1138_v19 }
 0x4b5   : > { %v1262_v24 = vadd.f32 %v1249_v23, %v1234_v22 }
 0x4b7   : > { %v1266_v25 = vmul.f32 0.17677669, %v1262_v24 }
 0x4b9   : > { %v1272_v27 = vsel %vm561_vm1, %v1266_v25, -inf }
 0x4ba   : > { %v1227_v28 = vpop.f32.mrf.mxu3  ;;  %1273 = vmax.xlane.f32.xlu2 %v1272_v27  ;;  %v1448_v27 = vld [vmem:[%s2631_s2 + $0x8] sm:$0xff] }
 0x4bb   : > { %v1235_v29 = vadd.f32 %v1227_v28, %v1141_v26  ;;  %v1449_v26 = vld [vmem:[%s2631_s2 + $0x10] sm:$0xff]  ;;  %v1447_v28 = vld [vmem:[%s2631_s2] sm:$0xff] }
 0x4bd   : > { %v1263_v31 = vadd.f32 %v1254_v30, %v1235_v29 }
 0x4bf   : > { %v1267_v32 = vmul.f32 0.17677669, %v1263_v31 }
 0x4c1   : > { %v1275_v37 = vsel %vm561_vm1, %v1267_v32, -inf }
 0x4c2   : > { %v1230_v38 = vpop.f32.mrf.mxu3  ;;  %1276 = vmax.xlane.f32.xlu0 %v1275_v37 }
 0x4c3   : > { %v1236_v39 = vadd.f32 %v1230_v38, %v1144_v33 }
 0x4c5   : > { %v1264_v42 = vadd.f32 %v1259_v41, %v1236_v39 }
 0x4c7   : > { %v1268_v43 = vmul.f32 0.17677669, %v1264_v42 }
 0x4c9   : > { %v1278_v44 = vsel %vm561_vm1, %v1268_v43, -inf }
 0x4ca   : > { %1279 = vmax.xlane.f32.xlu2 %v1278_v44 }
 0x4d6   : > { %1326 = vrot.lane.b32.xlu0 %v2394_v15, %s2113_s12  ;;  %s1746_s12 = sshll.u32 %s2204_s24, 3 }
 0x4de   : > { %1404 = vrot.lane.b32.xlu0 %v2394_v15, %s2114_s14 }
 0x525   : > { %v1271_v45 = vpop.xlane.xlu1 %1270 }
 0x526   : > { %v1281_v46 = vsub.f32 %v1265_v18, %v1271_v45 }
 0x528   : > { %v1285_v47 = vmul.f32 1.442695, %v1281_v46 }
 0x52a   : > { %1854 = vpow2.f32 %v1285_v47 }
 0x52d   : > { %v1274_v48 = vpop.xlane.xlu2 %1273 }
 0x52e   : > { %v1282_v49 = vsub.f32 %v1266_v25, %v1274_v48  ;;  %v1450_v25 = vld [vmem:[%s2631_s2 + $0x18] sm:$0xff] }
 0x530   : > { %v1855_v50 = vpop.eup %1854  ;;  %v1287_v51 = vmul.f32 1.442695, %v1282_v49 }
 0x531   : > { %v1293_v52 = vsel %vm561_vm1, %v1855_v50, 0.0 }
 0x532   : > { %1856 = vpow2.f32 %v1287_v51  ;;  %1294 = vadd.xlane.f32.xlu1 %v1293_v52 }
 0x535   : > { %v1277_v53 = vpop.xlane.xlu0 %1276 }
 0x536   : > { %v1283_v54 = vsub.f32 %v1267_v32, %v1277_v53 }
 0x538   : > { %v1857_v55 = vpop.eup %1856  ;;  %v1289_v56 = vmul.f32 1.442695, %v1283_v54 }
 0x539   : > { %v1296_v57 = vsel %vm561_vm1, %v1857_v55, 0.0 }
 0x53a   : > { %1858 = vpow2.f32 %v1289_v56  ;;  %1297 = vadd.xlane.f32.xlu2 %v1296_v57 }
 0x53d   : > { %v1280_v58 = vpop.xlane.xlu2 %1279 }
 0x53e   : > { %v1284_v17 = vsub.f32 %v1268_v43, %v1280_v58 }
 0x540   : > { %v1859_v34 = vpop.eup %1858  ;;  %v1291_v59 = vmul.f32 1.442695, %v1284_v17 }
 0x541   : > { %v1299_v60 = vsel %vm561_vm1, %v1859_v34, 0.0 }
 0x542   : > { %1860 = vpow2.f32 %v1291_v59  ;;  %1300 = vadd.xlane.f32.xlu1 %v1299_v60 }
 0x548   : > { %v1861_v61 = vpop.eup %1860  ;;  %v1327_v36 = vpop.permute.xlu0 %1326 }
 0x549   : > { %1347 = vmatpush.msra.mxu1 %v1327_v36  ;;  %v1302_v62 = vsel %vm561_vm1, %v1861_v61, 0.0 }
 0x54a   : > { %1303 = vadd.xlane.f32.xlu2 %v1302_v62 }
 0x550   : > { %v1405_v20 = vpop.permute.xlu0 %1404 }
 0x55b   : > { %1352 = vrot.lane.b32.xlu1 %v2394_v15, %s2115_s6 }
 0x562   : > { %1378 = vrot.lane.b32.xlu2 %v2394_v15, %s2116_s30  ;;  %s2670_s30 = sld [smem:[#allocation26_spill]] }
 0x568   : > { %s1491_s26 = scalar_lea.hbm %s2670_s30, %s1746_s12  ;;  %s2040_s20 = scalar_lea.hbm %s2670_s30, 16 }
 0x5a5   : > { %v1295_v0 = vpop.xlane.xlu1 %1294 }
 0x5a6   : > { %1862 = vrcp.f32 %v1295_v0 }
 0x5ac   : > { %v1863_v2 = vpop.eup %1862 }
 0x5ad   : > { %v1309_v4 = vmul.f32 %v1863_v2, %v1855_v50  ;;  %v1298_v15 = vpop.xlane.xlu2 %1297 }
 0x5ae   : > { %1864 = vrcp.f32 %v1298_v15 }
 0x5af   : > { %v1318_v5 = vsel %vm2554_vm5, -1e+09, %v1309_v4 }
 0x5b0   : > { %1322 = vst.msk [vmem:[%s520_s5] sm:$0xff] %vm561_vm1, %v1318_v5  ;;  %1740 = vmatmul.msk.f32.vlgmr.msra.gmra.mxu1 %vm561_vm1, %v1318_v5 }
 0x5b4   : > { %v1865_v40 = vpop.eup %1864 }
 0x5b5   : > { %v1310_v6 = vmul.f32 %v1865_v40, %v1857_v55  ;;  %v1301_v7 = vpop.xlane.xlu1 %1300 }
 0x5b6   : > { %1866 = vrcp.f32 %v1301_v7 }
 0x5b7   : > { %v1319_v8 = vsel %vm2554_vm5, -1e+09, %v1310_v6 }
 0x5b8   : > { %1323 = vst.msk [vmem:[%s520_s5 + $0x8] sm:$0xff] %vm561_vm1, %v1319_v8 }
 0x5bc   : > { %v1867_v9 = vpop.eup %1866 }
 0x5bd   : > { %v1311_v10 = vmul.f32 %v1867_v9, %v1859_v34  ;;  %v1304_v11 = vpop.xlane.xlu2 %1303 }
 0x5be   : > { %1868 = vrcp.f32 %v1304_v11 }
 0x5bf   : > { %v1320_v12 = vsel %vm2554_vm5, -1e+09, %v1311_v10 }
 0x5c0   : > { %1324 = vst.msk [vmem:[%s520_s5 + $0x10] sm:$0xff] %vm561_vm1, %v1320_v12 }
 0x5c4   : > { %v1869_v13 = vpop.eup %1868 }
 0x5c5   : > { %v1312_v14 = vmul.f32 %v1869_v13, %v1861_v61  ;;  %v1379_v16 = vpop.permute.xlu2 %1378 }
 0x5c6   : > { %1399 = vmatpush.msra.mxu0 %v1379_v16 }
 0x5c7   : > { %1742 = vmatmul.msk.f32.vlgmr.msra.gmra.mxu0 %vm561_vm1, %v1320_v12  ;;  %v1321_v18 = vsel %vm2554_vm5, -1e+09, %v1312_v14 }
 0x5c8   : > { %1325 = vst.msk [vmem:[%s520_s5 + $0x18] sm:$0xff] %vm561_vm1, %v1321_v18  ;;  %1466 = vmatpush.msrb.mxu0 %v1450_v25  ;;  %s1493_s5 = sshll.u32 %s503_s16, 4  ;;  %s1494_s5 = int_to_ptr.vmem [resolvable:$true] %s1493_s5 }
 0x5ca   : > { %1467 = vmatpush.msrb.mxu0 %v1449_v26 }
 0x5cc   : > { %1468 = vmatpush.msrb.mxu0 %v1448_v27 }
 0x5cd   : > { %v1353_v19 = vpop.permute.xlu1 %1352 }
 0x5ce   : > { %1373 = vmatpush.msrb.mxu1 %v1353_v19  ;;  %1469 = vmatpush.msrb.mxu0 %v1447_v28 }
 0x5cf   : > { %1741 = vmatmul.msk.f32.vlgmr.msrb.gmra.mxu1 %vm561_vm1, %v1319_v8 }
 0x5d0   : > { %1425 = vmatpush.msra.mxu1 %v1405_v20 }
 0x5d7   : > { %1743 = vmatmul.msk.f32.vlgmr.msra.gmra.mxu1 %vm561_vm1, %v1321_v18 }
 0x62d   : > { %v1349_v21 = vpop.f32.mrf.mxu1 }
 0x644   : > { %v1401_v22 = vpop.f32.mrf.mxu0 }
 0x645   : > { %1435 = vrot.lane.b32.xlu1 %v1401_v22, %s2117_s21  ;;  %s1495_s21 = sshll.u32 %s1491_s26, 4  ;;  %s1496_s21 = int_to_ptr.hbm [resolvable:$true] %s1495_s21 }
 0x64c   : > { %v1375_v23 = vpop.f32.mrf.mxu1 }
 0x64d   : > { %1431 = vrot.lane.b32.xlu0 %v1375_v23, %s2118_s29  ;;  %s1476_s29 = scalar_lea.sflag [#allocation4], %s2317_s7 }
 0x654   : > { %v1427_v24 = vpop.f32.mrf.mxu1 }
 0x655   : > { %1439 = vrot.lane.b32.xlu0 %v1427_v24, %s2119_s28  ;;  %s2034_s28 = sshra.s32 %s1496_s21, 4  ;;  %s2035_s28 = int_to_ptr.hbm [resolvable:$true] %s2034_s28 }
 0x656   : > { %s2036_s10 = scalar_lea.hbm %s2035_s28, 8  ;;  %p2041_p9 = scmp.lt.s32.totalorder %s2035_s28, %s2670_s30 }
 0x657   : > { %p2037_p3 = scmp.ne.s32.totalorder %s2035_s28, %s2036_s10  ;;  %p2042_p8 = scmp.lt.s32.totalorder %s2040_s20, %s2036_s10 }
 0x659   : > { %p2038_p13 = pnand %p2037_p3, %p2260_p0  ;;  %p2043_p10 = por %p2042_p8, %p2041_p9 }
 0x65b   : > { %p2039_p7 = pneg %p2038_p13 }
 0x65d   : > { %p2044_p11 = pnand %p2043_p10, %p2039_p7 }
 0x6b7   : > { %v1436_v31 = vpop.permute.xlu1 %1435 }
 0x6bf   : > { %v1432_v29 = vpop.permute.xlu0 %1431 }
 0x6c0   : > { %v1442_v30 = vsel %vm561_vm1, %v1349_v21, %v1432_v29 }
 0x6c1   : > { %v1444_v32 = vsel %vm1443_vm6, %v1442_v30, %v1436_v31 }
 0x6c7   : > { %v1440_v33 = vpop.permute.xlu0 %1439 }
 0x6c8   : > { %v1446_v37 = vsel %vm1445_vm7, %v1444_v32, %v1440_v33 }
 0x6c9   : > { %1744 = vmatmul.msk.f32.vlgmr.msrb.gmra.mxu0 %vm756_vm2, %v1446_v37 }
 0x746   : > { %v1471_v38 = vpop.f32.mrf.mxu0 }
 0x747   : > { %1474 = vst.msk [vmem:[%s503_s16] sm:$0xff] %vm756_vm2, %v1471_v38 }
 0x748   : > { %2047 = shalt.err (!%p2044_p11)
}
 0x749   : > { %1768 = dma.vmem_to_hbm [thread:$0]  (%p2260_p0), %s1494_s5, 128, %s1496_s21, %s1476_s29  }
 0x74a PF: > { %s2671_s7 = sld [smem:[#allocation17_spill]] }
 0x74b   : > { %s2673_s13 = sld [smem:[#allocation19_spill]] }
 0x750   : > { %s1510_s23 = sand.u32 1, %s2671_s7  }
 0x751   : > { %p2674_p5 = scmp.ge.s32.totalorder %s2673_s13, 2  ;;  %s1511_s19 = scalar_lea.sflag [#allocation4], %s1510_s23 }
 0x753   : > { %p1788_p12 = pnand %p2674_p5, %p2268_p6 }
 0x755   : > { %p1789_p2 = pneg %p1788_p12 }
 0x757   : > { %2081 = dma.done.wait (%p1789_p2), %s1511_s19, 128  }
 0x758   : > { %2083 = vsyncadd (%p1789_p2), %s1511_s19, 4294967168  ;;  %s2675_s20 = sld [smem:[#allocation20_spill]]  ;;  %s2678_s17 = smov %s2090_s18 }
 0x759   : > { %s2676_s12 = sld [smem:[#allocation18_spill]] }
 0x75a   : > { %s2677_s19 = sld [smem:[#allocation21_spill]] }
 0x75e   : > { %p29_p4 = scmp.ge.s32.totalorder %s2675_s20, 4  }
 0x75f   : > { %s2679_s18 = smov %s2676_s12 }
 0x760   :  { %31 = sbr.rel (!%p29_p4) target bundleno = 13 (0xd), region = 151 }
 0x765   :  { %1525 = vsyncpa [#allocation3], 1 }
 0x766   :  { %1527 = vsyncpa [#allocation3 + $0x1], 1 }
 0x767   :  { %1528 = vsyncpa [#allocation6], 1 }
 0x768   :  { %1530 = vsyncpa [#allocation6 + $0x1], 1 }
 0x769   :  { %1531 = vsyncpa [#allocation9], 1 }
 0x76a   :  { %1532 = vsyncpa [#allocation4], 1 }
 0x76b   :  { %1534 = vsyncpa [#allocation4 + $0x1], 1 }

</bundles_post_ra>
